<compile_context>
chip_gen: v6e
topology: v6e:2x2x1
jax: 0.10.0
libtpu: 0.0.40
codegen_flags: <defaults>
</compile_context>

<pallas_src>
import functools
import math

import jax
import jax.numpy as jnp
from jax.experimental import pallas as pl
from jax.experimental.pallas import tpu as pltpu

EMBED_DIM = 128
VAC_LAYERS = 3


# ---------------------------------------------------------------------------
# Elementwise helpers (used identically in the kernel and the reference)
# ---------------------------------------------------------------------------
def _gelu(x):
    # TODO(synk): PyTorch nn.GELU defaults to the exact erf form; the tanh
    # approximation used here differs by <~1e-3 but keeps lowering EUP-only.
    c = 0.7978845608028654  # sqrt(2/pi)
    return 0.5 * x * (1.0 + jnp.tanh(c * (x + 0.044715 * x * x * x)))


def _sigmoid(x):
    # Exactly equal to 1/(1+exp(-x)) but lowers to one EUP tanh + a cheap fma
    # instead of exp + a VALU divide sequence.
    return 0.5 * (jnp.tanh(0.5 * x) + 1.0)


# ---------------------------------------------------------------------------
# Fused kernel: 3 Channel_Distortion blocks + final GAP, B_TILE images / step
# ---------------------------------------------------------------------------
def _cdp_kernel(x_ref, w1_ref, b1_ref, w2t_ref, b2_ref, wc_ref, bc_ref,
                wc1_ref, bc1_ref, w3_ref, b3_ref, o_ref,
                *, b_tile, hw, fuse_conv3):
    c = x_ref.shape[-1]
    x = x_ref[...]                                     # [b_tile*hw, c] f32

    for l in range(VAC_LAYERS):
        # --- channel-attention branch (per image), kept entirely in f32 ----
        x3d = x.reshape(b_tile, hw, c)
        xm = jnp.mean(x3d, axis=1)                     # [b_tile, c]
        t = _gelu(jnp.dot(xm, w1_ref[l],
                          preferred_element_type=jnp.float32)
                  + b1_ref[l])                          # [b_tile, c/4]
        # conv1 maps C/4 -> 1: multiply + lane-reduce (no 1-column matmul).
        s = _sigmoid(jnp.sum(t * w2t_ref[l], axis=-1, keepdims=True)
                     + b2_ref[l])                       # [b_tile, 1]
        x1 = (x3d * s[:, None, :]).reshape(b_tile * hw, c)

        # --- spatial branch: bf16 MXU matmuls, f32 accumulation/elementwise -
        h = _gelu(jnp.dot(x.astype(jnp.bfloat16), wc_ref[l],
                          preferred_element_type=jnp.float32)
                  + bc_ref[l])                          # [rows, c/2]
        x2 = _sigmoid(jnp.dot(h.astype(jnp.bfloat16), wc1_ref[l],
                              preferred_element_type=jnp.float32)
                      + bc1_ref[l])                     # [rows, c]

        # --- conv3(cat(x1, x2)) ---------------------------------------------
        if fuse_conv3:
            # One K=2C matmul (fills the 256x256 MXU on v6e/v7x).
            cat = jnp.concatenate(
                [x1.astype(jnp.bfloat16), x2.astype(jnp.bfloat16)], axis=-1)
            x = jnp.dot(cat, w3_ref[l],
                        preferred_element_type=jnp.float32) + b3_ref[l]
        else:
            # v5e: two K=C matmuls (128x128 MXU tiles already full).
            w3l = w3_ref[l]                             # [2c, c] bf16
            x = (jnp.dot(x1.astype(jnp.bfloat16), w3l[:c],
                         preferred_element_type=jnp.float32)
                 + jnp.dot(x2.astype(jnp.bfloat16), w3l[c:],
                           preferred_element_type=jnp.float32)
                 + b3_ref[l])

    # final AdaptiveAvgPool2d(1): one lane-dense [1, c] row per image.
    o_ref[...] = jnp.mean(x.reshape(b_tile, hw, c), axis=1, keepdims=True)


# ---------------------------------------------------------------------------
def _pick_b_tile(n, hw, target_rows=512):
    """Largest divisor of n such that M = b*hw stays ~<=512 rows while keeping
    at least 2 grid steps (so v7x's 2 TensorCores both get work)."""
    best = 1
    for b in range(2, n + 1):
        if n % b != 0:
            continue
        if b * hw > target_rows:
            break
        if n // b < 2:
            break
        best = b
    return best


def _use_fused_conv3():
    # K=256 conv3 fusion only pays off on the 256x256-MXU generations.
    try:
        return "v5" not in jax.devices()[0].device_kind.lower()
    except Exception:
        return True


def channel_distortion_perception(x_nchw, packed, *, b_tile=None):
    """x_nchw: [N, C, H, W] float32  ->  [N, C, 1, 1] float32."""
    n, c, h, w = x_nchw.shape
    hw = h * w
    if b_tile is None:
        b_tile = _pick_b_tile(n, hw)
    assert n % b_tile == 0
    grid = n // b_tile

    # TODO(synk): at scale, accept [N, H*W, C] directly from the producer to
    # avoid this standalone HBM transpose of the input.
    x2d = jnp.transpose(x_nchw, (0, 2, 3, 1)).reshape(n * hw, c)

    kernel = functools.partial(_cdp_kernel, b_tile=b_tile, hw=hw,
                               fuse_conv3=_use_fused_conv3())

    weight_specs = [
        pl.BlockSpec(p.shape, lambda i, z=(0,) * p.ndim: z) for p in packed
    ]

    out = pl.pallas_call(
        kernel,
        grid=(grid,),
        in_specs=[pl.BlockSpec((b_tile * hw, c), lambda i: (i, 0))]
        + weight_specs,
        out_specs=pl.BlockSpec((b_tile, 1, c), lambda i: (i, 0, 0)),
        out_shape=jax.ShapeDtypeStruct((n, 1, c), jnp.float32),
        compiler_params=pltpu.CompilerParams(
            dimension_semantics=("parallel",)),
    )(x2d, *packed)

    return out.reshape(n, c, 1, 1)


# ---------------------------------------------------------------------------
# Pure-JAX f32 reference (same math as the PyTorch module) for verification
# ---------------------------------------------------------------------------
def cdp_reference(x_nchw, params):
    n, c, h, w = x_nchw.shape
    x = jnp.transpose(x_nchw, (0, 2, 3, 1)).reshape(n, h * w, c)
    outs = []
    for i in range(n):
        xb = x[i]
        for (w1, b1, w2t, b2, wc, bc, wc1, bc1, w3, b3) in params:
            xm = jnp.mean(xb, axis=0, keepdims=True)
            t = _gelu(xm @ w1 + b1)
            s = _sigmoid(jnp.sum(t * w2t, axis=-1, keepdims=True) + b2)
            x1 = xb * s
            x2 = _sigmoid(_gelu(xb @ wc + bc) @ wc1 + bc1)
            xb = jnp.concatenate([x1, x2], axis=-1) @ w3 + b3
        outs.append(jnp.mean(xb, axis=0))
    return jnp.stack(outs).reshape(n, c, 1, 1)


# ---------------------------------------------------------------------------
def make_params(key, c=EMBED_DIM, layers=VAC_LAYERS):
    """Per-layer f32 parameter tuples (PyTorch-layout-equivalent math).
    conv3's [2C -> C] weight is stored [2C, C] with input channels in
    cat(x1, x2) order."""

    def wgt(k, shape, fan_in):
        return jax.random.normal(k, shape, jnp.float32) / math.sqrt(fan_in)

    def bias(k, shape):
        return 0.01 * jax.random.normal(k, shape, jnp.float32)

    params = []
    for lk in jax.random.split(key, layers):
        ks = jax.random.split(lk, 10)
        params.append((
            wgt(ks[0], (c, c // 4), c),          # conv    : C   -> C/4
            bias(ks[1], (1, c // 4)),
            wgt(ks[2], (1, c // 4), c // 4),     # conv1   : C/4 -> 1 (row form)
            bias(ks[3], (1, 1)),
            wgt(ks[4], (c, c // 2), c),          # conv_c  : C   -> C/2
            bias(ks[5], (1, c // 2)),
            wgt(ks[6], (c // 2, c), c // 2),     # conv_c1 : C/2 -> C
            bias(ks[7], (1, c)),
            wgt(ks[8], (2 * c, c), 2 * c),       # conv3   : 2C  -> C
            bias(ks[9], (1, c)),
        ))
    return params


def pack_params(params):
    """Stack per-layer weights into 10 [L, ...] arrays; matmul weights on the
    MXU path (wc, wc1, w3) are stored bf16, everything else stays f32."""
    def stack(idx, dt):
        return jnp.stack([p[idx] for p in params]).astype(dt)

    return (
        stack(0, jnp.float32),    # w1   [L, C, C/4]   (f32: attention chain)
        stack(1, jnp.float32),    # b1   [L, 1, C/4]
        stack(2, jnp.float32),    # w2t  [L, 1, C/4]
        stack(3, jnp.float32),    # b2   [L, 1, 1]
        stack(4, jnp.bfloat16),   # wc   [L, C, C/2]
        stack(5, jnp.float32),    # bc   [L, 1, C/2]
        stack(6, jnp.bfloat16),   # wc1  [L, C/2, C]
        stack(7, jnp.float32),    # bc1  [L, 1, C]
        stack(8, jnp.bfloat16),   # w3   [L, 2C, C]
        stack(9, jnp.float32),    # b3   [L, 1, C]
    )


if __name__ == "__main__":
    key = jax.random.PRNGKey(0)
    kp, kx = jax.random.split(key)

    params = make_params(kp)
    packed = pack_params(params)

    # x: [N=2, C=128 (module default embed_dim), H=8, W=8]
    x = jax.random.normal(kx, (2, EMBED_DIM, 8, 8), jnp.float32)

    out = jax.block_until_ready(channel_distortion_perception(x, packed))
    ref = jax.block_until_ready(cdp_reference(x, params))

    assert out.shape == (2, EMBED_DIM, 1, 1), out.shape
    max_err = float(jnp.max(jnp.abs(out - ref)))
    # Tolerance widened slightly vs the f32 reference because wc/wc1/w3
    # matmuls use bf16 operands (f32 accumulation) on the MXU.
    assert jnp.allclose(out, ref, rtol=2e-2, atol=2e-2), max_err
    print("KERNEL_OK")
</pallas_src>

<mosaic_0001>
module attributes {stable_mosaic.version = 11 : i64} {
  func.func @_cdp_kernel(%arg0: i32, %arg1: memref<64x128xf32, #tpu.memory_space<vmem>>, %arg2: memref<3x128x32xf32, #tpu.memory_space<vmem>>, %arg3: memref<3x1x32xf32, #tpu.memory_space<vmem>>, %arg4: memref<3x1x32xf32, #tpu.memory_space<vmem>>, %arg5: memref<3x1x1xf32, #tpu.memory_space<vmem>>, %arg6: memref<3x128x64xbf16, #tpu.memory_space<vmem>>, %arg7: memref<3x1x64xf32, #tpu.memory_space<vmem>>, %arg8: memref<3x64x128xbf16, #tpu.memory_space<vmem>>, %arg9: memref<3x1x128xf32, #tpu.memory_space<vmem>>, %arg10: memref<3x256x128xbf16, #tpu.memory_space<vmem>>, %arg11: memref<3x1x128xf32, #tpu.memory_space<vmem>>, %arg12: memref<1x1x128xf32, #tpu.memory_space<vmem>>) attributes {dimension_semantics = [#tpu.dimension_semantics<parallel>], iteration_bounds = array<i64: 2>, scalar_prefetch = 0 : i64, scratch_operands = 0 : i64, tpu.core_type = #tpu.core_type<tc>, window_params = [{transform_indices = @transform_0, window_bounds = array<i64: 64, 128>}, {pipeline_mode = #tpu.pipeline_mode<synchronous>, transform_indices = @transform_1, window_bounds = array<i64: 3, 128, 32>}, {pipeline_mode = #tpu.pipeline_mode<synchronous>, transform_indices = @transform_2, window_bounds = array<i64: 3, 1, 32>}, {pipeline_mode = #tpu.pipeline_mode<synchronous>, transform_indices = @transform_3, window_bounds = array<i64: 3, 1, 32>}, {pipeline_mode = #tpu.pipeline_mode<synchronous>, transform_indices = @transform_4, window_bounds = array<i64: 3, 1, 1>}, {pipeline_mode = #tpu.pipeline_mode<synchronous>, transform_indices = @transform_5, window_bounds = array<i64: 3, 128, 64>}, {pipeline_mode = #tpu.pipeline_mode<synchronous>, transform_indices = @transform_6, window_bounds = array<i64: 3, 1, 64>}, {pipeline_mode = #tpu.pipeline_mode<synchronous>, transform_indices = @transform_7, window_bounds = array<i64: 3, 64, 128>}, {pipeline_mode = #tpu.pipeline_mode<synchronous>, transform_indices = @transform_8, window_bounds = array<i64: 3, 1, 128>}, {pipeline_mode = #tpu.pipeline_mode<synchronous>, transform_indices = @transform_9, window_bounds = array<i64: 3, 256, 128>}, {pipeline_mode = #tpu.pipeline_mode<synchronous>, transform_indices = @transform_10, window_bounds = array<i64: 3, 1, 128>}, {transform_indices = @transform_11, window_bounds = array<i64: 1, 1, 128>}]} {
    %c0 = arith.constant 0 : index
    %c0_0 = arith.constant 0 : index
    %0 = vector.load %arg1[%c0, %c0_0] : memref<64x128xf32, #tpu.memory_space<vmem>>, vector<64x128xf32>
    %1 = vector.shape_cast %0 : vector<64x128xf32> to vector<1x64x128xf32>
    %cst = arith.constant dense<0.000000e+00> : vector<1x128xf32>
    %2 = vector.multi_reduction <add>, %1, %cst [1] : vector<1x64x128xf32> to vector<1x128xf32>
    %cst_1 = arith.constant 6.400000e+01 : f32
    %3 = vector.broadcast %cst_1 : f32 to vector<1x128xf32>
    %4 = arith.divf %2, %3 : vector<1x128xf32>
    %c0_2 = arith.constant 0 : index
    %c0_3 = arith.constant 0 : index
    %c0_4 = arith.constant 0 : index
    %5 = vector.load %arg2[%c0_2, %c0_3, %c0_4] : memref<3x128x32xf32, #tpu.memory_space<vmem>>, vector<1x128x32xf32>
    %6 = vector.shape_cast %5 : vector<1x128x32xf32> to vector<128x32xf32>
    %cst_5 = arith.constant dense<0.000000e+00> : vector<1x32xf32>
    %7 = tpu.matmul %4, %6, %cst_5 {dimension_numbers = #tpu.dot_dimension_numbers<[1], [0], [0], [1], [0, 0, 1, 1], [], []>} : vector<1x128xf32>, vector<128x32xf32>, vector<1x32xf32> -> vector<1x32xf32>
    %c0_6 = arith.constant 0 : index
    %c0_7 = arith.constant 0 : index
    %c0_8 = arith.constant 0 : index
    %8 = vector.load %arg3[%c0_6, %c0_7, %c0_8] : memref<3x1x32xf32, #tpu.memory_space<vmem>>, vector<1x1x32xf32>
    %9 = vector.shape_cast %8 : vector<1x1x32xf32> to vector<1x32xf32>
    %10 = arith.addf %7, %9 : vector<1x32xf32>
    %cst_9 = arith.constant 5.000000e-01 : f32
    %11 = vector.broadcast %cst_9 : f32 to vector<1x32xf32>
    %12 = arith.mulf %11, %10 : vector<1x32xf32>
    %cst_10 = arith.constant 4.471500e-02 : f32
    %13 = vector.broadcast %cst_10 : f32 to vector<1x32xf32>
    %14 = arith.mulf %13, %10 : vector<1x32xf32>
    %15 = arith.mulf %14, %10 : vector<1x32xf32>
    %16 = arith.mulf %15, %10 : vector<1x32xf32>
    %17 = arith.addf %10, %16 : vector<1x32xf32>
    %cst_11 = arith.constant 0.797884583 : f32
    %18 = vector.broadcast %cst_11 : f32 to vector<1x32xf32>
    %19 = arith.mulf %18, %17 : vector<1x32xf32>
    %20 = math.tanh %19 : vector<1x32xf32>
    %cst_12 = arith.constant 1.000000e+00 : f32
    %21 = vector.broadcast %cst_12 : f32 to vector<1x32xf32>
    %22 = arith.addf %21, %20 : vector<1x32xf32>
    %23 = arith.mulf %12, %22 : vector<1x32xf32>
    %c0_13 = arith.constant 0 : index
    %c0_14 = arith.constant 0 : index
    %c0_15 = arith.constant 0 : index
    %24 = vector.load %arg4[%c0_13, %c0_14, %c0_15] : memref<3x1x32xf32, #tpu.memory_space<vmem>>, vector<1x1x32xf32>
    %25 = vector.shape_cast %24 : vector<1x1x32xf32> to vector<1x32xf32>
    %26 = arith.mulf %23, %25 : vector<1x32xf32>
    %cst_16 = arith.constant dense<0.000000e+00> : vector<1xf32>
    %27 = vector.multi_reduction <add>, %26, %cst_16 [1] : vector<1x32xf32> to vector<1xf32>
    %28 = vector.shape_cast %27 : vector<1xf32> to vector<1x1xf32>
    %c0_17 = arith.constant 0 : index
    %c0_18 = arith.constant 0 : index
    %c0_19 = arith.constant 0 : index
    %29 = vector.load %arg5[%c0_17, %c0_18, %c0_19] : memref<3x1x1xf32, #tpu.memory_space<vmem>>, vector<1x1x1xf32>
    %30 = vector.shape_cast %29 : vector<1x1x1xf32> to vector<1x1xf32>
    %31 = arith.addf %28, %30 : vector<1x1xf32>
    %cst_20 = arith.constant 5.000000e-01 : f32
    %32 = vector.broadcast %cst_20 : f32 to vector<1x1xf32>
    %33 = arith.mulf %32, %31 : vector<1x1xf32>
    %34 = math.tanh %33 : vector<1x1xf32>
    %cst_21 = arith.constant 1.000000e+00 : f32
    %35 = vector.broadcast %cst_21 : f32 to vector<1x1xf32>
    %36 = arith.addf %34, %35 : vector<1x1xf32>
    %cst_22 = arith.constant 5.000000e-01 : f32
    %37 = vector.broadcast %cst_22 : f32 to vector<1x1xf32>
    %38 = arith.mulf %37, %36 : vector<1x1xf32>
    %39 = vector.shape_cast %38 : vector<1x1xf32> to vector<1x1x1xf32>
    %40 = vector.broadcast %39 : vector<1x1x1xf32> to vector<1x64x128xf32>
    %41 = arith.mulf %1, %40 : vector<1x64x128xf32>
    %42 = vector.shape_cast %41 : vector<1x64x128xf32> to vector<64x128xf32>
    %43 = arith.truncf %0 : vector<64x128xf32> to vector<64x128xbf16>
    %c0_23 = arith.constant 0 : index
    %c0_24 = arith.constant 0 : index
    %c0_25 = arith.constant 0 : index
    %44 = vector.load %arg6[%c0_23, %c0_24, %c0_25] : memref<3x128x64xbf16, #tpu.memory_space<vmem>>, vector<1x128x64xbf16>
    %45 = vector.shape_cast %44 : vector<1x128x64xbf16> to vector<128x64xbf16>
    %cst_26 = arith.constant dense<0.000000e+00> : vector<64x64xf32>
    %46 = tpu.matmul %43, %45, %cst_26 {dimension_numbers = #tpu.dot_dimension_numbers<[1], [0], [0], [1], [0, 0, 1, 1], [], []>} : vector<64x128xbf16>, vector<128x64xbf16>, vector<64x64xf32> -> vector<64x64xf32>
    %c0_27 = arith.constant 0 : index
    %c0_28 = arith.constant 0 : index
    %c0_29 = arith.constant 0 : index
    %47 = vector.load %arg7[%c0_27, %c0_28, %c0_29] : memref<3x1x64xf32, #tpu.memory_space<vmem>>, vector<1x1x64xf32>
    %48 = vector.shape_cast %47 : vector<1x1x64xf32> to vector<1x64xf32>
    %49 = vector.broadcast %48 : vector<1x64xf32> to vector<64x64xf32>
    %50 = arith.addf %46, %49 : vector<64x64xf32>
    %cst_30 = arith.constant 5.000000e-01 : f32
    %51 = vector.broadcast %cst_30 : f32 to vector<64x64xf32>
    %52 = arith.mulf %51, %50 : vector<64x64xf32>
    %cst_31 = arith.constant 4.471500e-02 : f32
    %53 = vector.broadcast %cst_31 : f32 to vector<64x64xf32>
    %54 = arith.mulf %53, %50 : vector<64x64xf32>
    %55 = arith.mulf %54, %50 : vector<64x64xf32>
    %56 = arith.mulf %55, %50 : vector<64x64xf32>
    %57 = arith.addf %50, %56 : vector<64x64xf32>
    %cst_32 = arith.constant 0.797884583 : f32
    %58 = vector.broadcast %cst_32 : f32 to vector<64x64xf32>
    %59 = arith.mulf %58, %57 : vector<64x64xf32>
    %60 = math.tanh %59 : vector<64x64xf32>
    %cst_33 = arith.constant 1.000000e+00 : f32
    %61 = vector.broadcast %cst_33 : f32 to vector<64x64xf32>
    %62 = arith.addf %61, %60 : vector<64x64xf32>
    %63 = arith.mulf %52, %62 : vector<64x64xf32>
    %64 = arith.truncf %63 : vector<64x64xf32> to vector<64x64xbf16>
    %c0_34 = arith.constant 0 : index
    %c0_35 = arith.constant 0 : index
    %c0_36 = arith.constant 0 : index
    %65 = vector.load %arg8[%c0_34, %c0_35, %c0_36] : memref<3x64x128xbf16, #tpu.memory_space<vmem>>, vector<1x64x128xbf16>
    %66 = vector.shape_cast %65 : vector<1x64x128xbf16> to vector<64x128xbf16>
    %cst_37 = arith.constant dense<0.000000e+00> : vector<64x128xf32>
    %67 = tpu.matmul %64, %66, %cst_37 {dimension_numbers = #tpu.dot_dimension_numbers<[1], [0], [0], [1], [0, 0, 1, 1], [], []>} : vector<64x64xbf16>, vector<64x128xbf16>, vector<64x128xf32> -> vector<64x128xf32>
    %c0_38 = arith.constant 0 : index
    %c0_39 = arith.constant 0 : index
    %c0_40 = arith.constant 0 : index
    %68 = vector.load %arg9[%c0_38, %c0_39, %c0_40] : memref<3x1x128xf32, #tpu.memory_space<vmem>>, vector<1x1x128xf32>
    %69 = vector.shape_cast %68 : vector<1x1x128xf32> to vector<1x128xf32>
    %70 = vector.broadcast %69 : vector<1x128xf32> to vector<64x128xf32>
    %71 = arith.addf %67, %70 : vector<64x128xf32>
    %cst_41 = arith.constant 5.000000e-01 : f32
    %72 = vector.broadcast %cst_41 : f32 to vector<64x128xf32>
    %73 = arith.mulf %72, %71 : vector<64x128xf32>
    %74 = math.tanh %73 : vector<64x128xf32>
    %cst_42 = arith.constant 1.000000e+00 : f32
    %75 = vector.broadcast %cst_42 : f32 to vector<64x128xf32>
    %76 = arith.addf %74, %75 : vector<64x128xf32>
    %cst_43 = arith.constant 5.000000e-01 : f32
    %77 = vector.broadcast %cst_43 : f32 to vector<64x128xf32>
    %78 = arith.mulf %77, %76 : vector<64x128xf32>
    %79 = arith.truncf %42 : vector<64x128xf32> to vector<64x128xbf16>
    %80 = arith.truncf %78 : vector<64x128xf32> to vector<64x128xbf16>
    %81 = tpu.concatenate %79, %80 in 1 : vector<64x128xbf16>, vector<64x128xbf16> -> vector<64x256xbf16>
    %c0_44 = arith.constant 0 : index
    %c0_45 = arith.constant 0 : index
    %c0_46 = arith.constant 0 : index
    %82 = vector.load %arg10[%c0_44, %c0_45, %c0_46] : memref<3x256x128xbf16, #tpu.memory_space<vmem>>, vector<1x256x128xbf16>
    %83 = vector.shape_cast %82 : vector<1x256x128xbf16> to vector<256x128xbf16>
    %cst_47 = arith.constant dense<0.000000e+00> : vector<64x128xf32>
    %84 = tpu.matmul %81, %83, %cst_47 {dimension_numbers = #tpu.dot_dimension_numbers<[1], [0], [0], [1], [0, 0, 1, 1], [], []>} : vector<64x256xbf16>, vector<256x128xbf16>, vector<64x128xf32> -> vector<64x128xf32>
    %c0_48 = arith.constant 0 : index
    %c0_49 = arith.constant 0 : index
    %c0_50 = arith.constant 0 : index
    %85 = vector.load %arg11[%c0_48, %c0_49, %c0_50] : memref<3x1x128xf32, #tpu.memory_space<vmem>>, vector<1x1x128xf32>
    %86 = vector.shape_cast %85 : vector<1x1x128xf32> to vector<1x128xf32>
    %87 = vector.broadcast %86 : vector<1x128xf32> to vector<64x128xf32>
    %88 = arith.addf %84, %87 : vector<64x128xf32>
    %89 = vector.shape_cast %88 : vector<64x128xf32> to vector<1x64x128xf32>
    %cst_51 = arith.constant dense<0.000000e+00> : vector<1x128xf32>
    %90 = vector.multi_reduction <add>, %89, %cst_51 [1] : vector<1x64x128xf32> to vector<1x128xf32>
    %cst_52 = arith.constant 6.400000e+01 : f32
    %91 = vector.broadcast %cst_52 : f32 to vector<1x128xf32>
    %92 = arith.divf %90, %91 : vector<1x128xf32>
    %c1 = arith.constant 1 : index
    %c0_53 = arith.constant 0 : index
    %c0_54 = arith.constant 0 : index
    %93 = vector.load %arg2[%c1, %c0_53, %c0_54] : memref<3x128x32xf32, #tpu.memory_space<vmem>>, vector<1x128x32xf32>
    %94 = vector.shape_cast %93 : vector<1x128x32xf32> to vector<128x32xf32>
    %cst_55 = arith.constant dense<0.000000e+00> : vector<1x32xf32>
    %95 = tpu.matmul %92, %94, %cst_55 {dimension_numbers = #tpu.dot_dimension_numbers<[1], [0], [0], [1], [0, 0, 1, 1], [], []>} : vector<1x128xf32>, vector<128x32xf32>, vector<1x32xf32> -> vector<1x32xf32>
    %c1_56 = arith.constant 1 : index
    %c0_57 = arith.constant 0 : index
    %c0_58 = arith.constant 0 : index
    %96 = vector.load %arg3[%c1_56, %c0_57, %c0_58] : memref<3x1x32xf32, #tpu.memory_space<vmem>>, vector<1x1x32xf32>
    %97 = vector.shape_cast %96 : vector<1x1x32xf32> to vector<1x32xf32>
    %98 = arith.addf %95, %97 : vector<1x32xf32>
    %cst_59 = arith.constant 5.000000e-01 : f32
    %99 = vector.broadcast %cst_59 : f32 to vector<1x32xf32>
    %100 = arith.mulf %99, %98 : vector<1x32xf32>
    %cst_60 = arith.constant 4.471500e-02 : f32
    %101 = vector.broadcast %cst_60 : f32 to vector<1x32xf32>
    %102 = arith.mulf %101, %98 : vector<1x32xf32>
    %103 = arith.mulf %102, %98 : vector<1x32xf32>
    %104 = arith.mulf %103, %98 : vector<1x32xf32>
    %105 = arith.addf %98, %104 : vector<1x32xf32>
    %cst_61 = arith.constant 0.797884583 : f32
    %106 = vector.broadcast %cst_61 : f32 to vector<1x32xf32>
    %107 = arith.mulf %106, %105 : vector<1x32xf32>
    %108 = math.tanh %107 : vector<1x32xf32>
    %cst_62 = arith.constant 1.000000e+00 : f32
    %109 = vector.broadcast %cst_62 : f32 to vector<1x32xf32>
    %110 = arith.addf %109, %108 : vector<1x32xf32>
    %111 = arith.mulf %100, %110 : vector<1x32xf32>
    %c1_63 = arith.constant 1 : index
    %c0_64 = arith.constant 0 : index
    %c0_65 = arith.constant 0 : index
    %112 = vector.load %arg4[%c1_63, %c0_64, %c0_65] : memref<3x1x32xf32, #tpu.memory_space<vmem>>, vector<1x1x32xf32>
    %113 = vector.shape_cast %112 : vector<1x1x32xf32> to vector<1x32xf32>
    %114 = arith.mulf %111, %113 : vector<1x32xf32>
    %cst_66 = arith.constant dense<0.000000e+00> : vector<1xf32>
    %115 = vector.multi_reduction <add>, %114, %cst_66 [1] : vector<1x32xf32> to vector<1xf32>
    %116 = vector.shape_cast %115 : vector<1xf32> to vector<1x1xf32>
    %c1_67 = arith.constant 1 : index
    %c0_68 = arith.constant 0 : index
    %c0_69 = arith.constant 0 : index
    %117 = vector.load %arg5[%c1_67, %c0_68, %c0_69] : memref<3x1x1xf32, #tpu.memory_space<vmem>>, vector<1x1x1xf32>
    %118 = vector.shape_cast %117 : vector<1x1x1xf32> to vector<1x1xf32>
    %119 = arith.addf %116, %118 : vector<1x1xf32>
    %cst_70 = arith.constant 5.000000e-01 : f32
    %120 = vector.broadcast %cst_70 : f32 to vector<1x1xf32>
    %121 = arith.mulf %120, %119 : vector<1x1xf32>
    %122 = math.tanh %121 : vector<1x1xf32>
    %cst_71 = arith.constant 1.000000e+00 : f32
    %123 = vector.broadcast %cst_71 : f32 to vector<1x1xf32>
    %124 = arith.addf %122, %123 : vector<1x1xf32>
    %cst_72 = arith.constant 5.000000e-01 : f32
    %125 = vector.broadcast %cst_72 : f32 to vector<1x1xf32>
    %126 = arith.mulf %125, %124 : vector<1x1xf32>
    %127 = vector.shape_cast %126 : vector<1x1xf32> to vector<1x1x1xf32>
    %128 = vector.broadcast %127 : vector<1x1x1xf32> to vector<1x64x128xf32>
    %129 = arith.mulf %89, %128 : vector<1x64x128xf32>
    %130 = vector.shape_cast %129 : vector<1x64x128xf32> to vector<64x128xf32>
    %131 = arith.truncf %88 : vector<64x128xf32> to vector<64x128xbf16>
    %c1_73 = arith.constant 1 : index
    %c0_74 = arith.constant 0 : index
    %c0_75 = arith.constant 0 : index
    %132 = vector.load %arg6[%c1_73, %c0_74, %c0_75] : memref<3x128x64xbf16, #tpu.memory_space<vmem>>, vector<1x128x64xbf16>
    %133 = vector.shape_cast %132 : vector<1x128x64xbf16> to vector<128x64xbf16>
    %cst_76 = arith.constant dense<0.000000e+00> : vector<64x64xf32>
    %134 = tpu.matmul %131, %133, %cst_76 {dimension_numbers = #tpu.dot_dimension_numbers<[1], [0], [0], [1], [0, 0, 1, 1], [], []>} : vector<64x128xbf16>, vector<128x64xbf16>, vector<64x64xf32> -> vector<64x64xf32>
    %c1_77 = arith.constant 1 : index
    %c0_78 = arith.constant 0 : index
    %c0_79 = arith.constant 0 : index
    %135 = vector.load %arg7[%c1_77, %c0_78, %c0_79] : memref<3x1x64xf32, #tpu.memory_space<vmem>>, vector<1x1x64xf32>
    %136 = vector.shape_cast %135 : vector<1x1x64xf32> to vector<1x64xf32>
    %137 = vector.broadcast %136 : vector<1x64xf32> to vector<64x64xf32>
    %138 = arith.addf %134, %137 : vector<64x64xf32>
    %cst_80 = arith.constant 5.000000e-01 : f32
    %139 = vector.broadcast %cst_80 : f32 to vector<64x64xf32>
    %140 = arith.mulf %139, %138 : vector<64x64xf32>
    %cst_81 = arith.constant 4.471500e-02 : f32
    %141 = vector.broadcast %cst_81 : f32 to vector<64x64xf32>
    %142 = arith.mulf %141, %138 : vector<64x64xf32>
    %143 = arith.mulf %142, %138 : vector<64x64xf32>
    %144 = arith.mulf %143, %138 : vector<64x64xf32>
    %145 = arith.addf %138, %144 : vector<64x64xf32>
    %cst_82 = arith.constant 0.797884583 : f32
    %146 = vector.broadcast %cst_82 : f32 to vector<64x64xf32>
    %147 = arith.mulf %146, %145 : vector<64x64xf32>
    %148 = math.tanh %147 : vector<64x64xf32>
    %cst_83 = arith.constant 1.000000e+00 : f32
    %149 = vector.broadcast %cst_83 : f32 to vector<64x64xf32>
    %150 = arith.addf %149, %148 : vector<64x64xf32>
    %151 = arith.mulf %140, %150 : vector<64x64xf32>
    %152 = arith.truncf %151 : vector<64x64xf32> to vector<64x64xbf16>
    %c1_84 = arith.constant 1 : index
    %c0_85 = arith.constant 0 : index
    %c0_86 = arith.constant 0 : index
    %153 = vector.load %arg8[%c1_84, %c0_85, %c0_86] : memref<3x64x128xbf16, #tpu.memory_space<vmem>>, vector<1x64x128xbf16>
    %154 = vector.shape_cast %153 : vector<1x64x128xbf16> to vector<64x128xbf16>
    %cst_87 = arith.constant dense<0.000000e+00> : vector<64x128xf32>
    %155 = tpu.matmul %152, %154, %cst_87 {dimension_numbers = #tpu.dot_dimension_numbers<[1], [0], [0], [1], [0, 0, 1, 1], [], []>} : vector<64x64xbf16>, vector<64x128xbf16>, vector<64x128xf32> -> vector<64x128xf32>
    %c1_88 = arith.constant 1 : index
    %c0_89 = arith.constant 0 : index
    %c0_90 = arith.constant 0 : index
    %156 = vector.load %arg9[%c1_88, %c0_89, %c0_90] : memref<3x1x128xf32, #tpu.memory_space<vmem>>, vector<1x1x128xf32>
    %157 = vector.shape_cast %156 : vector<1x1x128xf32> to vector<1x128xf32>
    %158 = vector.broadcast %157 : vector<1x128xf32> to vector<64x128xf32>
    %159 = arith.addf %155, %158 : vector<64x128xf32>
    %cst_91 = arith.constant 5.000000e-01 : f32
    %160 = vector.broadcast %cst_91 : f32 to vector<64x128xf32>
    %161 = arith.mulf %160, %159 : vector<64x128xf32>
    %162 = math.tanh %161 : vector<64x128xf32>
    %cst_92 = arith.constant 1.000000e+00 : f32
    %163 = vector.broadcast %cst_92 : f32 to vector<64x128xf32>
    %164 = arith.addf %162, %163 : vector<64x128xf32>
    %cst_93 = arith.constant 5.000000e-01 : f32
    %165 = vector.broadcast %cst_93 : f32 to vector<64x128xf32>
    %166 = arith.mulf %165, %164 : vector<64x128xf32>
    %167 = arith.truncf %130 : vector<64x128xf32> to vector<64x128xbf16>
    %168 = arith.truncf %166 : vector<64x128xf32> to vector<64x128xbf16>
    %169 = tpu.concatenate %167, %168 in 1 : vector<64x128xbf16>, vector<64x128xbf16> -> vector<64x256xbf16>
    %c1_94 = arith.constant 1 : index
    %c0_95 = arith.constant 0 : index
    %c0_96 = arith.constant 0 : index
    %170 = vector.load %arg10[%c1_94, %c0_95, %c0_96] : memref<3x256x128xbf16, #tpu.memory_space<vmem>>, vector<1x256x128xbf16>
    %171 = vector.shape_cast %170 : vector<1x256x128xbf16> to vector<256x128xbf16>
    %cst_97 = arith.constant dense<0.000000e+00> : vector<64x128xf32>
    %172 = tpu.matmul %169, %171, %cst_97 {dimension_numbers = #tpu.dot_dimension_numbers<[1], [0], [0], [1], [0, 0, 1, 1], [], []>} : vector<64x256xbf16>, vector<256x128xbf16>, vector<64x128xf32> -> vector<64x128xf32>
    %c1_98 = arith.constant 1 : index
    %c0_99 = arith.constant 0 : index
    %c0_100 = arith.constant 0 : index
    %173 = vector.load %arg11[%c1_98, %c0_99, %c0_100] : memref<3x1x128xf32, #tpu.memory_space<vmem>>, vector<1x1x128xf32>
    %174 = vector.shape_cast %173 : vector<1x1x128xf32> to vector<1x128xf32>
    %175 = vector.broadcast %174 : vector<1x128xf32> to vector<64x128xf32>
    %176 = arith.addf %172, %175 : vector<64x128xf32>
    %177 = vector.shape_cast %176 : vector<64x128xf32> to vector<1x64x128xf32>
    %cst_101 = arith.constant dense<0.000000e+00> : vector<1x128xf32>
    %178 = vector.multi_reduction <add>, %177, %cst_101 [1] : vector<1x64x128xf32> to vector<1x128xf32>
    %cst_102 = arith.constant 6.400000e+01 : f32
    %179 = vector.broadcast %cst_102 : f32 to vector<1x128xf32>
    %180 = arith.divf %178, %179 : vector<1x128xf32>
    %c2 = arith.constant 2 : index
    %c0_103 = arith.constant 0 : index
    %c0_104 = arith.constant 0 : index
    %181 = vector.load %arg2[%c2, %c0_103, %c0_104] : memref<3x128x32xf32, #tpu.memory_space<vmem>>, vector<1x128x32xf32>
    %182 = vector.shape_cast %181 : vector<1x128x32xf32> to vector<128x32xf32>
    %cst_105 = arith.constant dense<0.000000e+00> : vector<1x32xf32>
    %183 = tpu.matmul %180, %182, %cst_105 {dimension_numbers = #tpu.dot_dimension_numbers<[1], [0], [0], [1], [0, 0, 1, 1], [], []>} : vector<1x128xf32>, vector<128x32xf32>, vector<1x32xf32> -> vector<1x32xf32>
    %c2_106 = arith.constant 2 : index
    %c0_107 = arith.constant 0 : index
    %c0_108 = arith.constant 0 : index
    %184 = vector.load %arg3[%c2_106, %c0_107, %c0_108] : memref<3x1x32xf32, #tpu.memory_space<vmem>>, vector<1x1x32xf32>
    %185 = vector.shape_cast %184 : vector<1x1x32xf32> to vector<1x32xf32>
    %186 = arith.addf %183, %185 : vector<1x32xf32>
    %cst_109 = arith.constant 5.000000e-01 : f32
    %187 = vector.broadcast %cst_109 : f32 to vector<1x32xf32>
    %188 = arith.mulf %187, %186 : vector<1x32xf32>
    %cst_110 = arith.constant 4.471500e-02 : f32
    %189 = vector.broadcast %cst_110 : f32 to vector<1x32xf32>
    %190 = arith.mulf %189, %186 : vector<1x32xf32>
    %191 = arith.mulf %190, %186 : vector<1x32xf32>
    %192 = arith.mulf %191, %186 : vector<1x32xf32>
    %193 = arith.addf %186, %192 : vector<1x32xf32>
    %cst_111 = arith.constant 0.797884583 : f32
    %194 = vector.broadcast %cst_111 : f32 to vector<1x32xf32>
    %195 = arith.mulf %194, %193 : vector<1x32xf32>
    %196 = math.tanh %195 : vector<1x32xf32>
    %cst_112 = arith.constant 1.000000e+00 : f32
    %197 = vector.broadcast %cst_112 : f32 to vector<1x32xf32>
    %198 = arith.addf %197, %196 : vector<1x32xf32>
    %199 = arith.mulf %188, %198 : vector<1x32xf32>
    %c2_113 = arith.constant 2 : index
    %c0_114 = arith.constant 0 : index
    %c0_115 = arith.constant 0 : index
    %200 = vector.load %arg4[%c2_113, %c0_114, %c0_115] : memref<3x1x32xf32, #tpu.memory_space<vmem>>, vector<1x1x32xf32>
    %201 = vector.shape_cast %200 : vector<1x1x32xf32> to vector<1x32xf32>
    %202 = arith.mulf %199, %201 : vector<1x32xf32>
    %cst_116 = arith.constant dense<0.000000e+00> : vector<1xf32>
    %203 = vector.multi_reduction <add>, %202, %cst_116 [1] : vector<1x32xf32> to vector<1xf32>
    %204 = vector.shape_cast %203 : vector<1xf32> to vector<1x1xf32>
    %c2_117 = arith.constant 2 : index
    %c0_118 = arith.constant 0 : index
    %c0_119 = arith.constant 0 : index
    %205 = vector.load %arg5[%c2_117, %c0_118, %c0_119] : memref<3x1x1xf32, #tpu.memory_space<vmem>>, vector<1x1x1xf32>
    %206 = vector.shape_cast %205 : vector<1x1x1xf32> to vector<1x1xf32>
    %207 = arith.addf %204, %206 : vector<1x1xf32>
    %cst_120 = arith.constant 5.000000e-01 : f32
    %208 = vector.broadcast %cst_120 : f32 to vector<1x1xf32>
    %209 = arith.mulf %208, %207 : vector<1x1xf32>
    %210 = math.tanh %209 : vector<1x1xf32>
    %cst_121 = arith.constant 1.000000e+00 : f32
    %211 = vector.broadcast %cst_121 : f32 to vector<1x1xf32>
    %212 = arith.addf %210, %211 : vector<1x1xf32>
    %cst_122 = arith.constant 5.000000e-01 : f32
    %213 = vector.broadcast %cst_122 : f32 to vector<1x1xf32>
    %214 = arith.mulf %213, %212 : vector<1x1xf32>
    %215 = vector.shape_cast %214 : vector<1x1xf32> to vector<1x1x1xf32>
    %216 = vector.broadcast %215 : vector<1x1x1xf32> to vector<1x64x128xf32>
    %217 = arith.mulf %177, %216 : vector<1x64x128xf32>
    %218 = vector.shape_cast %217 : vector<1x64x128xf32> to vector<64x128xf32>
    %219 = arith.truncf %176 : vector<64x128xf32> to vector<64x128xbf16>
    %c2_123 = arith.constant 2 : index
    %c0_124 = arith.constant 0 : index
    %c0_125 = arith.constant 0 : index
    %220 = vector.load %arg6[%c2_123, %c0_124, %c0_125] : memref<3x128x64xbf16, #tpu.memory_space<vmem>>, vector<1x128x64xbf16>
    %221 = vector.shape_cast %220 : vector<1x128x64xbf16> to vector<128x64xbf16>
    %cst_126 = arith.constant dense<0.000000e+00> : vector<64x64xf32>
    %222 = tpu.matmul %219, %221, %cst_126 {dimension_numbers = #tpu.dot_dimension_numbers<[1], [0], [0], [1], [0, 0, 1, 1], [], []>} : vector<64x128xbf16>, vector<128x64xbf16>, vector<64x64xf32> -> vector<64x64xf32>
    %c2_127 = arith.constant 2 : index
    %c0_128 = arith.constant 0 : index
    %c0_129 = arith.constant 0 : index
    %223 = vector.load %arg7[%c2_127, %c0_128, %c0_129] : memref<3x1x64xf32, #tpu.memory_space<vmem>>, vector<1x1x64xf32>
    %224 = vector.shape_cast %223 : vector<1x1x64xf32> to vector<1x64xf32>
    %225 = vector.broadcast %224 : vector<1x64xf32> to vector<64x64xf32>
    %226 = arith.addf %222, %225 : vector<64x64xf32>
    %cst_130 = arith.constant 5.000000e-01 : f32
    %227 = vector.broadcast %cst_130 : f32 to vector<64x64xf32>
    %228 = arith.mulf %227, %226 : vector<64x64xf32>
    %cst_131 = arith.constant 4.471500e-02 : f32
    %229 = vector.broadcast %cst_131 : f32 to vector<64x64xf32>
    %230 = arith.mulf %229, %226 : vector<64x64xf32>
    %231 = arith.mulf %230, %226 : vector<64x64xf32>
    %232 = arith.mulf %231, %226 : vector<64x64xf32>
    %233 = arith.addf %226, %232 : vector<64x64xf32>
    %cst_132 = arith.constant 0.797884583 : f32
    %234 = vector.broadcast %cst_132 : f32 to vector<64x64xf32>
    %235 = arith.mulf %234, %233 : vector<64x64xf32>
    %236 = math.tanh %235 : vector<64x64xf32>
    %cst_133 = arith.constant 1.000000e+00 : f32
    %237 = vector.broadcast %cst_133 : f32 to vector<64x64xf32>
    %238 = arith.addf %237, %236 : vector<64x64xf32>
    %239 = arith.mulf %228, %238 : vector<64x64xf32>
    %240 = arith.truncf %239 : vector<64x64xf32> to vector<64x64xbf16>
    %c2_134 = arith.constant 2 : index
    %c0_135 = arith.constant 0 : index
    %c0_136 = arith.constant 0 : index
    %241 = vector.load %arg8[%c2_134, %c0_135, %c0_136] : memref<3x64x128xbf16, #tpu.memory_space<vmem>>, vector<1x64x128xbf16>
    %242 = vector.shape_cast %241 : vector<1x64x128xbf16> to vector<64x128xbf16>
    %cst_137 = arith.constant dense<0.000000e+00> : vector<64x128xf32>
    %243 = tpu.matmul %240, %242, %cst_137 {dimension_numbers = #tpu.dot_dimension_numbers<[1], [0], [0], [1], [0, 0, 1, 1], [], []>} : vector<64x64xbf16>, vector<64x128xbf16>, vector<64x128xf32> -> vector<64x128xf32>
    %c2_138 = arith.constant 2 : index
    %c0_139 = arith.constant 0 : index
    %c0_140 = arith.constant 0 : index
    %244 = vector.load %arg9[%c2_138, %c0_139, %c0_140] : memref<3x1x128xf32, #tpu.memory_space<vmem>>, vector<1x1x128xf32>
    %245 = vector.shape_cast %244 : vector<1x1x128xf32> to vector<1x128xf32>
    %246 = vector.broadcast %245 : vector<1x128xf32> to vector<64x128xf32>
    %247 = arith.addf %243, %246 : vector<64x128xf32>
    %cst_141 = arith.constant 5.000000e-01 : f32
    %248 = vector.broadcast %cst_141 : f32 to vector<64x128xf32>
    %249 = arith.mulf %248, %247 : vector<64x128xf32>
    %250 = math.tanh %249 : vector<64x128xf32>
    %cst_142 = arith.constant 1.000000e+00 : f32
    %251 = vector.broadcast %cst_142 : f32 to vector<64x128xf32>
    %252 = arith.addf %250, %251 : vector<64x128xf32>
    %cst_143 = arith.constant 5.000000e-01 : f32
    %253 = vector.broadcast %cst_143 : f32 to vector<64x128xf32>
    %254 = arith.mulf %253, %252 : vector<64x128xf32>
    %255 = arith.truncf %218 : vector<64x128xf32> to vector<64x128xbf16>
    %256 = arith.truncf %254 : vector<64x128xf32> to vector<64x128xbf16>
    %257 = tpu.concatenate %255, %256 in 1 : vector<64x128xbf16>, vector<64x128xbf16> -> vector<64x256xbf16>
    %c2_144 = arith.constant 2 : index
    %c0_145 = arith.constant 0 : index
    %c0_146 = arith.constant 0 : index
    %258 = vector.load %arg10[%c2_144, %c0_145, %c0_146] : memref<3x256x128xbf16, #tpu.memory_space<vmem>>, vector<1x256x128xbf16>
    %259 = vector.shape_cast %258 : vector<1x256x128xbf16> to vector<256x128xbf16>
    %cst_147 = arith.constant dense<0.000000e+00> : vector<64x128xf32>
    %260 = tpu.matmul %257, %259, %cst_147 {dimension_numbers = #tpu.dot_dimension_numbers<[1], [0], [0], [1], [0, 0, 1, 1], [], []>} : vector<64x256xbf16>, vector<256x128xbf16>, vector<64x128xf32> -> vector<64x128xf32>
    %c2_148 = arith.constant 2 : index
    %c0_149 = arith.constant 0 : index
    %c0_150 = arith.constant 0 : index
    %261 = vector.load %arg11[%c2_148, %c0_149, %c0_150] : memref<3x1x128xf32, #tpu.memory_space<vmem>>, vector<1x1x128xf32>
    %262 = vector.shape_cast %261 : vector<1x1x128xf32> to vector<1x128xf32>
    %263 = vector.broadcast %262 : vector<1x128xf32> to vector<64x128xf32>
    %264 = arith.addf %260, %263 : vector<64x128xf32>
    %265 = vector.shape_cast %264 : vector<64x128xf32> to vector<1x64x128xf32>
    %cst_151 = arith.constant dense<0.000000e+00> : vector<1x128xf32>
    %266 = vector.multi_reduction <add>, %265, %cst_151 [1] : vector<1x64x128xf32> to vector<1x128xf32>
    %267 = vector.shape_cast %266 : vector<1x128xf32> to vector<1x1x128xf32>
    %cst_152 = arith.constant 6.400000e+01 : f32
    %268 = vector.broadcast %cst_152 : f32 to vector<1x1x128xf32>
    %269 = arith.divf %267, %268 : vector<1x1x128xf32>
    %c0_153 = arith.constant 0 : index
    %c0_154 = arith.constant 0 : index
    %c0_155 = arith.constant 0 : index
    %270 = vector.load %arg12[%c0_153, %c0_154, %c0_155] : memref<1x1x128xf32, #tpu.memory_space<vmem>>, vector<1x1x128xf32>
    tpu.vector_store %arg12[%c0_153, %c0_154, %c0_155], %269 {strides = array<i32>} : memref<1x1x128xf32, #tpu.memory_space<vmem>>, vector<1x1x128xf32>,
    return
  }
  func.func @transform_0(%arg0: i32) -> (i32, i32) {
    %c0_i32 = arith.constant 0 : i32
    %c0_i32_0 = arith.constant 0 : i32
    return %arg0, %c0_i32 : i32, i32
  }
  func.func @transform_1(%arg0: i32) -> (i32, i32, i32) {
    %c0_i32 = arith.constant 0 : i32
    %c0_i32_0 = arith.constant 0 : i32
    %c0_i32_1 = arith.constant 0 : i32
    %c0_i32_2 = arith.constant 0 : i32
    return %c0_i32, %c0_i32_0, %c0_i32_1 : i32, i32, i32
  }
  func.func @transform_2(%arg0: i32) -> (i32, i32, i32) {
    %c0_i32 = arith.constant 0 : i32
    %c0_i32_0 = arith.constant 0 : i32
    %c0_i32_1 = arith.constant 0 : i32
    %c0_i32_2 = arith.constant 0 : i32
    return %c0_i32, %c0_i32_0, %c0_i32_1 : i32, i32, i32
  }
  func.func @transform_3(%arg0: i32) -> (i32, i32, i32) {
    %c0_i32 = arith.constant 0 : i32
    %c0_i32_0 = arith.constant 0 : i32
    %c0_i32_1 = arith.constant 0 : i32
    %c0_i32_2 = arith.constant 0 : i32
    return %c0_i32, %c0_i32_0, %c0_i32_1 : i32, i32, i32
  }
  func.func @transform_4(%arg0: i32) -> (i32, i32, i32) {
    %c0_i32 = arith.constant 0 : i32
    %c0_i32_0 = arith.constant 0 : i32
    %c0_i32_1 = arith.constant 0 : i32
    %c0_i32_2 = arith.constant 0 : i32
    return %c0_i32, %c0_i32_0, %c0_i32_1 : i32, i32, i32
  }
  func.func @transform_5(%arg0: i32) -> (i32, i32, i32) {
    %c0_i32 = arith.constant 0 : i32
    %c0_i32_0 = arith.constant 0 : i32
    %c0_i32_1 = arith.constant 0 : i32
    %c0_i32_2 = arith.constant 0 : i32
    return %c0_i32, %c0_i32_0, %c0_i32_1 : i32, i32, i32
  }
  func.func @transform_6(%arg0: i32) -> (i32, i32, i32) {
    %c0_i32 = arith.constant 0 : i32
    %c0_i32_0 = arith.constant 0 : i32
    %c0_i32_1 = arith.constant 0 : i32
    %c0_i32_2 = arith.constant 0 : i32
    return %c0_i32, %c0_i32_0, %c0_i32_1 : i32, i32, i32
  }
  func.func @transform_7(%arg0: i32) -> (i32, i32, i32) {
    %c0_i32 = arith.constant 0 : i32
    %c0_i32_0 = arith.constant 0 : i32
    %c0_i32_1 = arith.constant 0 : i32
    %c0_i32_2 = arith.constant 0 : i32
    return %c0_i32, %c0_i32_0, %c0_i32_1 : i32, i32, i32
  }
  func.func @transform_8(%arg0: i32) -> (i32, i32, i32) {
    %c0_i32 = arith.constant 0 : i32
    %c0_i32_0 = arith.constant 0 : i32
    %c0_i32_1 = arith.constant 0 : i32
    %c0_i32_2 = arith.constant 0 : i32
    return %c0_i32, %c0_i32_0, %c0_i32_1 : i32, i32, i32
  }
  func.func @transform_9(%arg0: i32) -> (i32, i32, i32) {
    %c0_i32 = arith.constant 0 : i32
    %c0_i32_0 = arith.constant 0 : i32
    %c0_i32_1 = arith.constant 0 : i32
    %c0_i32_2 = arith.constant 0 : i32
    return %c0_i32, %c0_i32_0, %c0_i32_1 : i32, i32, i32
  }
  func.func @transform_10(%arg0: i32) -> (i32, i32, i32) {
    %c0_i32 = arith.constant 0 : i32
    %c0_i32_0 = arith.constant 0 : i32
    %c0_i32_1 = arith.constant 0 : i32
    %c0_i32_2 = arith.constant 0 : i32
    return %c0_i32, %c0_i32_0, %c0_i32_1 : i32, i32, i32
  }
  func.func @transform_11(%arg0: i32) -> (i32, i32, i32) {
    %c0_i32 = arith.constant 0 : i32
    %c0_i32_0 = arith.constant 0 : i32
    %c0_i32_1 = arith.constant 0 : i32
    return %arg0, %c0_i32, %c0_i32_0 : i32, i32, i32
  }
}

</mosaic_0001>

<bundles_post_ra>
// kernel: tpu_custom_call.1
= control target key start
LH: loop header
LB: loop body
LE: loop exit
PB: predicated region body
PF: predicated region fallthrough
CT: control target
= control target key end

     0   :  { %s4582_s0 = inlined_call_operand.vmem [shape: f32[128,128], index: 0, kind: input, shape index: {}]   ;;  %s4583_s1 = inlined_call_operand.vmem [shape: f32[3,128,32], index: 1, kind: input, shape index: {}]   ;;  %s4584_s2 = inlined_call_operand.vmem [shape: f32[3,1,32], index: 2, kind: input, shape index: {}]   ;;  %s4585_s3 = inlined_call_operand.vmem [shape: f32[3,1,32], index: 3, kind: input, shape index: {}]   ;;  %s4586_s4 = inlined_call_operand.vmem [shape: f32[3,1,1], index: 4, kind: input, shape index: {}]   ;;  %s4587_s5 = inlined_call_operand.vmem [shape: bf16[3,128,64], index: 5, kind: input, shape index: {}]   ;;  %s4588_s6 = inlined_call_operand.vmem [shape: f32[3,1,64], index: 6, kind: input, shape index: {}]   ;;  %s4589_s7 = inlined_call_operand.vmem [shape: bf16[3,64,128], index: 7, kind: input, shape index: {}]   ;;  %s4590_s8 = inlined_call_operand.vmem [shape: f32[3,1,128], index: 8, kind: input, shape index: {}]   ;;  %s4591_s9 = inlined_call_operand.vmem [shape: bf16[3,256,128], index: 9, kind: input, shape index: {}]   ;;  %s4592_s10 = inlined_call_operand.vmem [shape: f32[3,1,128], index: 10, kind: input, shape index: {}]   ;;  %s4593_s11 = inlined_call_operand.hbm [shape: f32[2,1,128], index: 11, kind: output, shape index: {}]  }
   0x1   :  { %4594 = sst [smem:[#allocation6_spill]] %s4582_s0 }
   0x2   :  { %16 = vsyncpa [#allocation3], 0 }
   0x3   :  { %18 = vsyncpa [#allocation3 + $0x1], 0  ;;  %s3706_s17 = smov 0   ;;  %s3708_s18 = smov 0  }
   0x4   :  { %s3710_s19 = smov 0   ;;  %s3712_s20 = smov 0  }
   0x5 LB: > { %s3727_s21 = sadd.s32 4294967295, %s3641_s20   ;;  %s2616_s22 = sadd.s32 4294967294, %s3641_s20   ;;  %s3641_s20 = sphi %s3712_s20, %s4603_s20   ;;  %s3637_s19 = sphi %s3710_s19, %s4602_s19   ;;  %s3633_s18 = sphi %s3708_s18, %s4601_s18   ;;  %s3629_s17 = sphi %s3706_s17, %s4600_s17  }
   0x6   : > { %s3731_s23 = sadd.s32 1, %s3641_s20   ;;  %s267_s24 = sadd.s32 1, %s3637_s19 }
   0x7   : > { %s264_s25 = ssub.s32 %s3641_s20, %s3731_s23  ;;  %p277_p0 = scmp.ne.s32.totalorder %s3637_s19, %s3633_s18 }
   0x8   : > { %p265_p1 = scmp.eq.s32.totalorder %s264_s25, 0  ;;  %p278_p2 = scmp.eq.s32.totalorder %s3727_s21, 1 }
   0x9   : > { %p283_p3 = scmp.ne.s32.totalorder %s3633_s18, %s3629_s17  ;;  %p284_p4 = scmp.eq.s32.totalorder %s2616_s22, 1 }
   0xa   : > { %s3742_s26 = scalar_select %p265_p1, %s3637_s19, %s267_s24  }
   0xb   : > { %p3744_p5 = por %p278_p2, %p277_p0  ;;  %p3748_p6 = por %p284_p4, %p283_p3 }
   0xc   : > { %4595 = sst [smem:[#allocation5_spill]] %s3742_s26  ;;  %p2619_p7 = scmp.ge.s32.totalorder %s3641_s20, 1 }
   0xd   : > { %p341_p8 = scmp.lt.s32.totalorder %s3641_s20, 3 }
   0xf   : > { %p342_p9 = pnand %p2619_p7, %p341_p8 }
  0x10   : > { %s2620_s16 = sshll.u32 (!%p342_p9), %s3727_s21, 3  ;;  %s4598_s0 = sld [smem:[#allocation6_spill]] (!%p342_p9) }
  0x11   : > { %345 = sbr.rel (%p342_p9) target bundleno = 2135 (0x857), region = 64  ;;  %p381_p10 = scmp.lt.s32.totalorder (!%p342_p9), %s2620_s16, 15 }
  0x12   : > { %s378_s14 = sand.u32 (!%p342_p9), 1, %s3633_s18   ;;  %s3645_s12 = smov (!%p342_p9), [#allocation2]  }
  0x13   : > { %s379_s15 = scalar_lea.vmem (!%p342_p9), [#allocation2], %s378_s14  ;;  %s2549_s29 = scalar_lea.sflag (!%p342_p9), [#allocation3], %s378_s14 }
  0x14   : > { %s2561_s22 = sshll.u32 (!%p342_p9), %s379_s15, 4  ;;  %s3585_s13 = sshll.u32 (!%p342_p9), %s3645_s12, 4  ;;  %s2562_s22 = int_to_ptr.vmem [resolvable:$true] %s2561_s22  ;;  %s3586_s13 = int_to_ptr.vmem [resolvable:$false] %s3585_s13 }
  0x15   : > { %p3588_p0 = scmp.lt.s32.totalorder (!%p342_p9), %s2562_s22, %s3586_s13 }
  0x16   : > { %v3389_v0 = vld [vmem:[%s4587_s5 + $0x38] sm:$0xff]   ;;  %v3643_v1 = vmov 0.0   ;;  %v424_v3 = vld [vmem:[%s4583_s1 + $0x70] sm:$0xff]  ;;  %v423_v5 = vld [vmem:[%s4583_s1 + $0x68] sm:$0xff]  ;;  %s4605_s16 = smov (!%p381_p10, %s2620_s16), 15  ;;  %vm3644_vm0 = vmmov 0  }
  0x17   : > { %3117 = vmatprep.subr.mxu0 %v3643_v1  ;;  %v425_v2 = vld [vmem:[%s4583_s1 + $0x78] sm:$0xff]  ;;  %3152 = vmatprep.subr.bf16.mxu1 %v3389_v0  ;;  %v3390_v4 = vld [vmem:[%s4587_s5 + $0x30] sm:$0xff]   ;;  %v3391_v6 = vld [vmem:[%s4587_s5 + $0x28] sm:$0xff]   ;;  %s2621_s24 = sshll.u32 %s4605_s16, 3  ;;  %vm785_vm1 = vcmask 523264   ;;  %vm508_vm2 = vcmask 253952  }
  0x18   : > { %3118 = vmatpush3.msra.mxu0 %v425_v2  ;;  %3153 = vmatpush3.bf16.msra.mxu1 %v3389_v0  ;;  %v422_v7 = vld [vmem:[%s4583_s1 + $0x60] sm:$0xff]  ;;  %v421_v8 = vld [vmem:[%s4583_s1 + $0x58] sm:$0xff]  ;;  %v420_v10 = vld [vmem:[%s4583_s1 + $0x50] sm:$0xff]  ;;  %s3795_s26 = scalar_lea.vmem %s4598_s0, %s2621_s24  ;;  %s2883_s16 = sshll.u32 %s3727_s21, 4 }
  0x19   : > { %3119 = vmatprep.subr.mxu0 %v3643_v1  ;;  %3154 = vmatprep.subr.bf16.mxu1 %v3390_v4  ;;  %v3392_v9 = vld [vmem:[%s4587_s5 + $0x20] sm:$0xff]   ;;  %v419_v11 = vld [vmem:[%s4583_s1 + $0x48] sm:$0xff]  ;;  %v3393_v12 = vld [vmem:[%s4587_s5 + $0x18] sm:$0xff]   ;;  %s3587_s21 = scalar_lea.vmem %s3586_s13, 32 }
  0x1a   : > { %3120 = vmatpush3.msra.mxu0 %v424_v3  ;;  %3149 = vmatprep.mubr.msk.f32.mxu0 %vm3644_vm0, %v3643_v1  ;;  %v418_v13 = vld [vmem:[%s4583_s1 + $0x40] sm:$0xff]  ;;  %v3812_v15 = vld [vmem:[%s3795_s26 + $0x8] sm:$0xff]  ;;  %v417_v16 = vld [vmem:[%s4583_s1 + $0x38] sm:$0xff] }
  0x1b   : > { %3121 = vmatprep.subr.mxu0 %v3643_v1  ;;  %v3809_v14 = vld [vmem:[%s3795_s26] sm:$0xff]  ;;  %v3822_v19 = vld [vmem:[%s3795_s26 + $0x10] sm:$0xff]  ;;  %v3832_v22 = vld [vmem:[%s3795_s26 + $0x18] sm:$0xff] }
  0x1c   : > { %3122 = vmatpush3.msra.mxu0 %v423_v5  ;;  %3155 = vmatpush3.bf16.msra.mxu1 %v3390_v4  ;;  %v395_v17 = vadd.f32 %v3812_v15, %v3809_v14  ;;  %v530_v18 = vpack.c.bf16 %v3812_v15, %v3809_v14  ;;  %v416_v20 = vld [vmem:[%s4583_s1 + $0x30] sm:$0xff]  ;;  %v3835_v23 = vld [vmem:[%s3795_s26 + $0x20] sm:$0xff]  ;;  %v415_v25 = vld [vmem:[%s4583_s1 + $0x28] sm:$0xff]  ;;  %v531_v42 = vpack.c.bf16 %v3832_v22, %v3822_v19 }
  0x1d   : > { %3123 = vmatprep.subr.mxu0 %v3643_v1  ;;  %3156 = vmatprep.subr.bf16.mxu1 %v3391_v6  ;;  %v3394_v21 = vld [vmem:[%s4587_s5 + $0x10] sm:$0xff]   ;;  %v3843_v26 = vld [vmem:[%s3795_s26 + $0x28] sm:$0xff]  ;;  %v414_v29 = vld [vmem:[%s4583_s1 + $0x20] sm:$0xff] }
  0x1e   : > { %3124 = vmatpush3.msra.mxu0 %v422_v7  ;;  %v396_v24 = vadd.f32 %v395_v17, %v3822_v19  ;;  %3168 = vmatprep.mubr.bf16.mxu1 %v530_v18  ;;  %v3395_v27 = vld [vmem:[%s4587_s5 + $0x8] sm:$0xff]   ;;  %v3854_v30 = vld [vmem:[%s3795_s26 + $0x30] sm:$0xff]  ;;  %v413_v32 = vld [vmem:[%s4583_s1 + $0x18] sm:$0xff]  ;;  %v532_v44 = vpack.c.bf16 %v3843_v26, %v3835_v23 }
  0x1f   : > { %3125 = vmatprep.subr.mxu0 %v3643_v1  ;;  %v3862_v33 = vld [vmem:[%s3795_s26 + $0x38] sm:$0xff]  ;;  %v3396_v34 = vld [vmem:[%s4587_s5] sm:$0xff]   ;;  %v412_v36 = vld [vmem:[%s4583_s1 + $0x10] sm:$0xff] }
  0x20   : > { %3126 = vmatpush3.msra.mxu0 %v421_v8  ;;  %3157 = vmatpush3.bf16.msra.mxu1 %v3391_v6  ;;  %v397_v28 = vadd.f32 %v396_v24, %v3832_v22  ;;  %v411_v38 = vld [vmem:[%s4583_s1 + $0x8] sm:$0xff]  ;;  %v410_v40 = vld [vmem:[%s4583_s1] sm:$0xff]  ;;  %v533_v49 = vpack.c.bf16 %v3862_v33, %v3854_v30  ;;  %v3397_v51 = vld [vmem:[%s4589_s7 + $0x18] sm:$0xff]  }
  0x21   : > { %3127 = vmatprep.subr.mxu0 %v3643_v1  ;;  %3158 = vmatprep.subr.bf16.mxu1 %v3392_v9  ;;  %v3398_v52 = vld [vmem:[%s4589_s7 + $0x10] sm:$0xff]   ;;  %v3399_v53 = vld [vmem:[%s4589_s7 + $0x8] sm:$0xff]   ;;  %v3400_v54 = vld [vmem:[%s4589_s7] sm:$0xff]  }
  0x22   : > { %3128 = vmatpush3.msra.mxu0 %v420_v10  ;;  %v398_v31 = vadd.f32 %v397_v28, %v3835_v23  ;;  %v2622_v55 = vld [vmem:[%s4588_s6] ss:$0 sm:$0xff] }
  0x23   : > { %3129 = vmatprep.subr.mxu0 %v3643_v1  ;;  %v426_v2 = vld [vmem:[%s4584_s2] sm:$0x1] }
  0x24   : > { %3130 = vmatpush3.msra.mxu0 %v419_v11  ;;  %3159 = vmatpush3.bf16.msra.mxu1 %v3392_v9  ;;  %v399_v35 = vadd.f32 %v398_v31, %v3843_v26 }
  0x25   : > { %3131 = vmatprep.subr.mxu0 %v3643_v1  ;;  %3160 = vmatprep.subr.bf16.mxu1 %v3393_v12 }
  0x26   : > { %3132 = vmatpush3.msra.mxu0 %v418_v13  ;;  %v400_v37 = vadd.f32 %v399_v35, %v3854_v30 }
  0x27   : > { %3133 = vmatprep.subr.mxu0 %v3643_v1 }
  0x28   : > { %3134 = vmatpush3.msra.mxu0 %v417_v16  ;;  %3161 = vmatpush3.bf16.msra.mxu1 %v3393_v12  ;;  %v401_v39 = vadd.f32 %v400_v37, %v3862_v33 }
  0x29   : > { %3135 = vmatprep.subr.mxu0 %v3643_v1  ;;  %3162 = vmatprep.subr.bf16.mxu1 %v3394_v21 }
  0x2a   : > { %3136 = vmatpush3.msra.mxu0 %v416_v20  ;;  %v402_v41 = vrot.slane %v401_v39, 4 }
  0x2b   : > { %3137 = vmatprep.subr.mxu0 %v3643_v1 }
  0x2c   : > { %3138 = vmatpush3.msra.mxu0 %v415_v25  ;;  %3163 = vmatpush3.bf16.msra.mxu1 %v3394_v21  ;;  %v403_v43 = vadd.f32 %v402_v41, %v401_v39 }
  0x2d   : > { %3139 = vmatprep.subr.mxu0 %v3643_v1  ;;  %3164 = vmatprep.subr.bf16.mxu1 %v3395_v27 }
  0x2e   : > { %3140 = vmatpush3.msra.mxu0 %v414_v29  ;;  %v404_v45 = vrot.slane %v403_v43, 2 }
  0x2f   : > { %3141 = vmatprep.subr.mxu0 %v3643_v1 }
  0x30   : > { %3142 = vmatpush3.msra.mxu0 %v413_v32  ;;  %3165 = vmatpush3.bf16.msra.mxu1 %v3395_v27  ;;  %v405_v46 = vadd.f32 %v404_v45, %v403_v43 }
  0x31   : > { %3143 = vmatprep.subr.mxu0 %v3643_v1  ;;  %3166 = vmatprep.subr.bf16.mxu1 %v3396_v34 }
  0x32   : > { %3144 = vmatpush3.msra.mxu0 %v412_v36  ;;  %v406_v47 = vrot.slane %v405_v46, 1 }
  0x33   : > { %3145 = vmatprep.subr.mxu0 %v3643_v1 }
  0x34   : > { %3146 = vmatpush3.msra.mxu0 %v411_v38  ;;  %3167 = vmatpush3.bf16.msra.mxu1 %v3396_v34  ;;  %v407_v48 = vadd.f32 %v406_v47, %v405_v46 }
  0x35   : > { %3147 = vmatprep.subr.mxu0 %v3643_v1 }
  0x36   : > { %3148 = vmatpush3.msra.mxu0 %v410_v40  ;;  %v409_v50 = vmul.f32 0.015625, %v407_v48 }
  0x37   : > { %3169 = vmatmul.mubr.bf16.vlgmr.msra.gmra.mxu1 %v531_v42  ;;  %3176 = vmatprep.subr.bf16.mxu0 %v3397_v51 }
  0x38   : > { %3172 = vmatprep.mubr.bf16.mxu1 %v532_v44  ;;  %3150 = vmatmul.mubr.f32.vlgmr.msra.gmra.mxu0 %v409_v50 }
  0x39   : > { %3177 = vmatpush3.bf16.msra.mxu0 %v3397_v51 }
  0x3a   : > { %3178 = vmatprep.subr.bf16.mxu0 %v3398_v52 }
  0x3d   : > { %3179 = vmatpush3.bf16.msra.mxu0 %v3398_v52 }
  0x3e   : > { %3180 = vmatprep.subr.bf16.mxu0 %v3399_v53 }
  0x3f   : > { %3173 = vmatmul.mubr.bf16.gmra.mxu1 %v533_v49 }
  0x41   : > { %3181 = vmatpush3.bf16.msra.mxu0 %v3399_v53 }
  0x42   : > { %3182 = vmatprep.subr.bf16.mxu0 %v3400_v54 }
  0x45   : > { %3183 = vmatpush3.bf16.msra.mxu0 %v3400_v54 }
  0x46   : > { %3192 = vmatprep.subr.mxu0 %v3643_v1 }
  0xf7   : > { %v3170_v56 = vpop.f32.mrf.mxu1 }
  0xf8   : > { %v3906_v57 = vadd.f32 %v3170_v56, %v2622_v55  ;;  %v493_v7 = vpop.f32.mrf.mxu0 }
  0xf9   : > { %v639_v58 = vpop.f32.mrf.mxu1  ;;  %v3924_v11 = vadd.f32 %v493_v7, %v426_v2 }
  0xfa   : > { %v680_v59 = vmul.f32 0.044715, %v3906_v57  ;;  %v3909_v60 = vadd.f32 %v2622_v55, %v639_v58  ;;  %v3151_v20 = vpop.f32.mrf.mxu0 }
  0xfb   : > { %v3171_v61 = vpop.f32.mrf.mxu1  ;;  %v498_v24 = vmul.f32 0.044715, %v3924_v11 }
  0xfc   : > { %v688_v62 = vmul.f32 %v680_v59, %v3906_v57  ;;  %v678_v63 = vmul.f32 0.044715, %v3909_v60  ;;  %v3913_v0 = vadd.f32 %v3171_v61, %v2622_v55 }
  0xfd   : > { %v642_v3 = vpop.f32.mrf.mxu1  ;;  %v499_v34 = vmul.f32 %v498_v24, %v3924_v11 }
  0xfe   : > { %v696_v4 = vmul.f32 %v688_v62, %v3906_v57  ;;  %v686_v5 = vmul.f32 %v678_v63, %v3909_v60  ;;  %v681_v6 = vmul.f32 0.044715, %v3913_v0  ;;  %v3921_v8 = vadd.f32 %v2622_v55, %v642_v3 }
  0xff   : > { %v3174_v9 = vpop.f32.mrf.mxu1  ;;  %v500_v44 = vmul.f32 %v499_v34, %v3924_v11  ;;  %v506_v34 = vld [vmem:[%s4585_s3] sm:$0x1] }
 0x100   : > { %v704_v10 = vadd.f32 %v696_v4, %v3906_v57  ;;  %v694_v12 = vmul.f32 %v686_v5, %v3909_v60  ;;  %v689_v13 = vmul.f32 %v681_v6, %v3913_v0  ;;  %v679_v16 = vmul.f32 0.044715, %v3921_v8 }
 0x101   : > { %v3929_v17 = vadd.f32 %v3174_v9, %v2622_v55  ;;  %v655_v18 = vpop.f32.mrf.mxu1  ;;  %v501_v50 = vadd.f32 %v500_v44, %v3924_v11  ;;  %v671_v24 = vmul.f32 0.5, %v3921_v8 }
 0x102   : > { %v712_v21 = vmul.f32 0.7978846, %v704_v10  ;;  %v702_v25 = vadd.f32 %v694_v12, %v3909_v60  ;;  %v697_v27 = vmul.f32 %v689_v13, %v3913_v0  ;;  %v687_v28 = vmul.f32 %v679_v16, %v3921_v8 }
 0x103   : > { %v684_v29 = vmul.f32 0.044715, %v3929_v17  ;;  %v3936_v31 = vadd.f32 %v2622_v55, %v655_v18  ;;  %v3175_v32 = vpop.f32.mrf.mxu1  ;;  %v502_v56 = vmul.f32 0.7978846, %v501_v50  ;;  %v673_v16 = vmul.f32 0.5, %v3913_v0 }
 0x104   : > { %3473 = vtanh.f32 %v712_v21  ;;  %v710_v35 = vmul.f32 0.7978846, %v702_v25  ;;  %v705_v36 = vadd.f32 %v697_v27, %v3913_v0  ;;  %v695_v37 = vmul.f32 %v687_v28, %v3921_v8 }
 0x105   : > { %v692_v38 = vmul.f32 %v684_v29, %v3929_v17  ;;  %v682_v39 = vmul.f32 0.044715, %v3936_v31  ;;  %v3943_v40 = vadd.f32 %v3175_v32, %v2622_v55  ;;  %v658_v41 = vpop.f32.mrf.mxu1  ;;  %v670_v21 = vmul.f32 0.5, %v3909_v60 }
 0x106   : > { %3475 = vtanh.f32 %v710_v35  ;;  %v713_v42 = vmul.f32 0.7978846, %v705_v36  ;;  %v659_v43 = vadd.f32 %v2622_v55, %v658_v41  ;;  %v703_v45 = vadd.f32 %v695_v37, %v3921_v8 }
 0x107   : > { %v700_v46 = vmul.f32 %v692_v38, %v3929_v17  ;;  %v690_v47 = vmul.f32 %v682_v39, %v3936_v31  ;;  %v685_v48 = vmul.f32 0.044715, %v3943_v40  ;;  %v672_v27 = vmul.f32 0.5, %v3906_v57 }
 0x108   : > { %3477 = vtanh.f32 %v713_v42  ;;  %v683_v49 = vmul.f32 0.044715, %v659_v43  ;;  %v711_v51 = vmul.f32 0.7978846, %v703_v45  ;;  %v497_v28 = vmul.f32 0.5, %v3924_v11 }
 0x109   : > { %v708_v52 = vadd.f32 %v700_v46, %v3929_v17  ;;  %v698_v53 = vmul.f32 %v690_v47, %v3936_v31  ;;  %v693_v54 = vmul.f32 %v685_v48, %v3943_v40  ;;  %v674_v44 = vmul.f32 0.5, %v3936_v31 }
 0x10a   : > { %v691_v55 = vmul.f32 %v683_v49, %v659_v43  ;;  %3479 = vtanh.f32 %v711_v51  ;;  %v675_v45 = vmul.f32 0.5, %v659_v43  ;;  %v677_v49 = vmul.f32 0.5, %v3943_v40 }
 0x10b   : > { %v706_v58 = vadd.f32 %v698_v53, %v3936_v31  ;;  %v701_v59 = vmul.f32 %v693_v54, %v3943_v40  ;;  %v716_v61 = vmul.f32 0.7978846, %v708_v52  ;;  %3481 = vtanh.f32 %v502_v56 }
 0x10c   : > { %v699_v62 = vmul.f32 %v691_v55, %v659_v43  ;;  %v676_v53 = vmul.f32 0.5, %v3929_v17  ;;  %v3403_v17 = vld [vmem:[%s4591_s9 + $0x70] sm:$0xff]  }
 0x10d   : > { %v714_v63 = vmul.f32 0.7978846, %v706_v58  ;;  %v709_v2 = vadd.f32 %v701_v59, %v3943_v40  ;;  %v3401_v40 = vld [vmem:[%s4591_s9 + $0x78] sm:$0xff]   ;;  %v3404_v58 = vld [vmem:[%s4591_s9 + $0x30] sm:$0xff]   ;;  %v3405_v59 = vld [vmem:[%s4591_s9 + $0x68] sm:$0xff]  }
 0x10e   : > { %v707_v3 = vadd.f32 %v699_v62, %v659_v43  ;;  %v3402_v43 = vld [vmem:[%s4591_s9 + $0x38] sm:$0xff]   ;;  %2923 = vmatprep.subr.bf16.mxu1 %v3401_v40  ;;  %v3407_v62 = vld [vmem:[%s4591_s9 + $0x60] sm:$0xff]  }
 0x10f   : > { %3483 = vtanh.f32 %v714_v63  ;;  %v717_v4 = vmul.f32 0.7978846, %v709_v2  ;;  %2924 = vmatpush3.bf16.msra.mxu1 %v3402_v43  ;;  %v3408_v63 = vld [vmem:[%s4591_s9 + $0x20] sm:$0xff]   ;;  %v3409_v2 = vld [vmem:[%s4591_s9 + $0x58] sm:$0xff]  }
 0x110   : > { %3485 = vtanh.f32 %v716_v61  ;;  %v715_v5 = vmul.f32 0.7978846, %v707_v3  ;;  %2925 = vmatprep.subr.bf16.mxu1 %v3403_v17  ;;  %v3406_v61 = vld [vmem:[%s4591_s9 + $0x28] sm:$0xff]   ;;  %v3410_v3 = vld [vmem:[%s4591_s9 + $0x18] sm:$0xff]  }
 0x111   : > { %v3474_v6 = vpop.eup %3473  ;;  %3487 = vtanh.f32 %v717_v4  ;;  %v3411_v4 = vld [vmem:[%s4591_s9 + $0x50] sm:$0xff]  }
 0x112   : > { %3489 = vtanh.f32 %v715_v5  ;;  %v728_v18 = vadd.f32 1.0, %v3474_v6  ;;  %v3412_v5 = vld [vmem:[%s4591_s9 + $0x10] sm:$0xff]   ;;  %v3413_v6 = vld [vmem:[%s4591_s9 + $0x48] sm:$0xff]  }
 0x113   : > { %v3476_v7 = vpop.eup %3475  ;;  %2926 = vmatpush3.bf16.msra.mxu1 %v3404_v58 }
 0x114   : > { %v726_v12 = vadd.f32 1.0, %v3476_v7  ;;  %v736_v38 = vmul.f32 %v728_v18, %v672_v27  ;;  %2927 = vmatprep.subr.bf16.mxu1 %v3405_v59  ;;  %v3414_v7 = vld [vmem:[%s4591_s9 + $0x8] sm:$0xff]   ;;  %v2631_v27 = vld [vmem:[%s4590_s8] ss:$0 sm:$0xff] }
 0x115   : > { %v3478_v9 = vpop.eup %3477 }
 0x116   : > { %v729_v10 = vadd.f32 1.0, %v3478_v9  ;;  %v734_v35 = vmul.f32 %v726_v12, %v670_v21  ;;  %v3415_v9 = vld [vmem:[%s4591_s9 + $0x40] sm:$0xff]   ;;  %v4026_v12 = vld [vmem:[%s4587_s5 + $0x78] sm:$0xff]  }
 0x117   : > { %v3480_v13 = vpop.eup %3479  ;;  %2928 = vmatpush3.bf16.msra.mxu1 %v3406_v61 }
 0x118   : > { %v3482_v20 = vpop.eup %3481  ;;  %v727_v25 = vadd.f32 1.0, %v3480_v13  ;;  %v737_v32 = vmul.f32 %v729_v10, %v673_v16  ;;  %2929 = vmatprep.subr.bf16.mxu1 %v3407_v62  ;;  %v3416_v10 = vld [vmem:[%s4591_s9] sm:$0xff]  }
 0x119   : > { %v504_v29 = vadd.f32 1.0, %v3482_v20  ;;  %v512_v13 = vld [vmem:[%s4586_s4] sm:$0x1] }
 0x11a   : > { %v735_v36 = vmul.f32 %v727_v25, %v671_v24  ;;  %v743_v57 = vpack.c.bf16 %v737_v32, %v736_v38 }
 0x11b   : > { %v505_v37 = vmul.f32 %v504_v29, %v497_v28  ;;  %2930 = vmatpush3.bf16.msra.mxu1 %v3408_v63 }
 0x11c   : > { %v3484_v0 = vpop.eup %3483  ;;  %v742_v8 = vpack.c.bf16 %v735_v36, %v734_v35  ;;  %2931 = vmatprep.subr.bf16.mxu1 %v3409_v2 }
 0x11d   : > { %v3486_v60 = vpop.eup %3485  ;;  %v507_v41 = vmul.f32 %v506_v34, %v505_v37  ;;  %v730_v42 = vadd.f32 1.0, %v3484_v0 }
 0x11e   : > { %v3488_v39 = vpop.eup %3487  ;;  %3184 = vmatprep.mubr.msk.bf16.mxu0 %vm785_vm1, %v742_v8  ;;  %v732_v50 = vadd.f32 1.0, %v3486_v60 }
 0x11f   : > { %v3490_v11 = vpop.eup %3489  ;;  %v733_v46 = vadd.f32 1.0, %v3488_v39  ;;  %v509_v47 = vsel %vm508_vm2, %v507_v41, 0.0  ;;  %3185 = vmatmul.mubr.msk.bf16.vlgmr.msra.gmra.mxu0 %vm785_vm1, %v743_v57  ;;  %v738_v51 = vmul.f32 %v730_v42, %v674_v44  ;;  %2932 = vmatpush3.bf16.msra.mxu1 %v3410_v3 }
 0x120   : > { %v731_v48 = vadd.f32 1.0, %v3490_v11  ;;  %510 = vadd.xlane.f32.xlu0 %v509_v47  ;;  %v740_v56 = vmul.f32 %v732_v50, %v676_v53  ;;  %2933 = vmatprep.subr.bf16.mxu1 %v3411_v4 }
 0x121   : > { %v741_v54 = vmul.f32 %v733_v46, %v677_v49 }
 0x122   : > { %v739_v52 = vmul.f32 %v731_v48, %v675_v45 }
 0x123   : > { %v745_v31 = vpack.c.bf16 %v741_v54, %v740_v56  ;;  %2934 = vmatpush3.bf16.msra.mxu1 %v3412_v5 }
 0x124   : > { %v744_v55 = vpack.c.bf16 %v739_v52, %v738_v51  ;;  %2935 = vmatprep.subr.bf16.mxu1 %v3413_v6  ;;  %v3418_v6 = vld [vmem:[%s4587_s5 + $0x70] sm:$0xff]  }
 0x126   : > { %3188 = vmatprep.mubr.msk.bf16.mxu0 %vm785_vm1, %v744_v55 }
 0x127   : > { %3189 = vmatmul.mubr.msk.bf16.gmra.mxu0 %vm785_vm1, %v745_v31  ;;  %2936 = vmatpush3.bf16.msra.mxu1 %v3414_v7 }
 0x128   : > { %3224 = vmatprep.mubr.msk.f32.mxu0 %vm3644_vm0, %v3643_v1  ;;  %2937 = vmatprep.subr.bf16.mxu1 %v3415_v9 }
 0x12b   : > { %2938 = vmatpush3.bf16.msra.mxu1 %v3416_v10 }
 0x12c   : > { %3227 = vmatprep.subr.bf16.mxu1 %v4026_v12 }
 0x1a9   : > { %v511_v16 = vpop.xlane.xlu0 %510 }
 0x1aa   : > { %v513_v18 = vadd.f32 %v512_v13, %v511_v16  ;;  %v3419_v16 = vld [vmem:[%s4587_s5 + $0x68] sm:$0xff]  }
 0x1ac   : > { %v514_v20 = vmul.f32 0.5, %v513_v18 }
 0x1ae   : > { %3491 = vtanh.f32 %v514_v20 }
 0x1bb   : > { %v3492_v21 = vpop.eup %3491 }
 0x1bc   : > { %v516_v24 = vadd.f32 1.0, %v3492_v21 }
 0x1be   : > { %v517_v25 = vmul.f32 0.5, %v516_v24 }
 0x1c0   : > { %3342 = vpush %v517_v25 }
 0x1df   : > { %v3186_v28 = vpop.f32.mrf.mxu0 }
 0x1e0   : > { %v841_v29 = vadd.f32 %v3186_v28, %v2631_v27 }
 0x1e1   : > { %v832_v32 = vpop.f32.mrf.mxu0 }
 0x1e2   : > { %v833_v34 = vadd.f32 %v2631_v27, %v832_v32  ;;  %v865_v35 = vmul.f32 0.5, %v841_v29 }
 0x1e3   : > { %v3187_v36 = vpop.f32.mrf.mxu0 }
 0x1e4   : > { %v863_v0 = vmul.f32 0.5, %v833_v34  ;;  %v844_v37 = vadd.f32 %v3187_v36, %v2631_v27 }
 0x1e5   : > { %v835_v38 = vpop.f32.mrf.mxu0 }
 0x1e6   : > { %3493 = vtanh.f32 %v863_v0  ;;  %v866_v60 = vmul.f32 0.5, %v844_v37  ;;  %v836_v8 = vadd.f32 %v2631_v27, %v835_v38  ;;  %v3420_v38 = vld [vmem:[%s4587_s5 + $0x60] sm:$0xff]  }
 0x1e7   : > { %3495 = vtanh.f32 %v865_v35  ;;  %v3190_v39 = vpop.f32.mrf.mxu0 }
 0x1e8   : > { %3497 = vtanh.f32 %v866_v60  ;;  %v864_v41 = vmul.f32 0.5, %v836_v8  ;;  %v857_v48 = vadd.f32 %v3190_v39, %v2631_v27  ;;  %v2672_v60 = vld [vmem:[%s4583_s1 + $0xf8] sm:$0xff]  ;;  %v2671_v8 = vld [vmem:[%s4583_s1 + $0xf0] sm:$0xff]  ;;  %v2670_v39 = vld [vmem:[%s4583_s1 + $0xe8] sm:$0xff] }
 0x1e9   : > { %v848_v57 = vpop.f32.mrf.mxu0  ;;  %3193 = vmatpush3.msra.mxu0 %v2672_v60 }
 0x1ea   : > { %3499 = vtanh.f32 %v864_v41  ;;  %v849_v42 = vadd.f32 %v2631_v27, %v848_v57  ;;  %v869_v53 = vmul.f32 0.5, %v857_v48  ;;  %3194 = vmatprep.subr.mxu0 %v3643_v1  ;;  %v2669_v41 = vld [vmem:[%s4583_s1 + $0xe0] sm:$0xff]  ;;  %v2668_v57 = vld [vmem:[%s4583_s1 + $0xd8] sm:$0xff] }
 0x1eb   : > { %v3191_v11 = vpop.f32.mrf.mxu0  ;;  %3195 = vmatpush3.msra.mxu0 %v2671_v8  ;;  %v2661_v48 = vld [vmem:[%s4583_s1 + $0xa0] sm:$0xff] }
 0x1ec   : > { %v867_v44 = vmul.f32 0.5, %v849_v42  ;;  %v860_v46 = vadd.f32 %v3191_v11, %v2631_v27  ;;  %3196 = vmatprep.subr.mxu0 %v3643_v1  ;;  %v2667_v42 = vld [vmem:[%s4583_s1 + $0xd0] sm:$0xff]  ;;  %v2666_v11 = vld [vmem:[%s4583_s1 + $0xc8] sm:$0xff] }
 0x1ed   : > { %v851_v45 = vpop.f32.mrf.mxu0  ;;  %3197 = vmatpush3.msra.mxu0 %v2670_v39 }
 0x1ee   : > { %v852_v47 = vadd.f32 %v2631_v27, %v851_v45  ;;  %3501 = vtanh.f32 %v867_v44  ;;  %v870_v50 = vmul.f32 0.5, %v860_v46  ;;  %3198 = vmatprep.subr.mxu0 %v3643_v1  ;;  %v2665_v44 = vld [vmem:[%s4583_s1 + $0xc0] sm:$0xff]  ;;  %v2664_v45 = vld [vmem:[%s4583_s1 + $0xb8] sm:$0xff]  ;;  %v2663_v46 = vld [vmem:[%s4583_s1 + $0xb0] sm:$0xff] }
 0x1ef   : > { %3199 = vmatpush3.msra.mxu0 %v2669_v41 }
 0x1f0   : > { %v868_v49 = vmul.f32 0.5, %v852_v47  ;;  %3200 = vmatprep.subr.mxu0 %v3643_v1  ;;  %v2662_v47 = vld [vmem:[%s4583_s1 + $0xa8] sm:$0xff] }
 0x1f1   : > { %s3343_s24 = spop %3342  ;;  %3201 = vmatpush3.msra.mxu0 %v2668_v57  ;;  %v3425_v57 = vld [vmem:[%s4589_s7 + $0x38] sm:$0xff]  }
 0x1f2   : > { %3503 = vtanh.f32 %v868_v49  ;;  %v520_v31 = vstv %s3343_s24  ;;  %3202 = vmatprep.subr.mxu0 %v3643_v1  ;;  %v2660_v49 = vld [vmem:[%s4583_s1 + $0x98] sm:$0xff]  ;;  %s2559_s24 = scalar_lea.hbm %s4593_s11, %s2883_s16 }
 0x1f3   : > { %v3494_v51 = vpop.eup %3493  ;;  %3505 = vtanh.f32 %v870_v50  ;;  %v522_v58 = vmul.f32 %v520_v31, %v3809_v14  ;;  %v523_v59 = vmul.f32 %v520_v31, %v3812_v15  ;;  %v524_v14 = vmul.f32 %v520_v31, %v3822_v19  ;;  %3203 = vmatpush3.msra.mxu0 %v2667_v42  ;;  %v2659_v50 = vld [vmem:[%s4583_s1 + $0x90] sm:$0xff] }
 0x1f4   : > { %v3496_v52 = vpop.eup %3495  ;;  %v879_v55 = vadd.f32 1.0, %v3494_v51  ;;  %3507 = vtanh.f32 %v869_v53  ;;  %v525_v15 = vmul.f32 %v520_v31, %v3832_v22  ;;  %v526_v19 = vmul.f32 %v520_v31, %v3835_v23  ;;  %v3421_v23 = vld [vmem:[%s4587_s5 + $0x58] sm:$0xff]   ;;  %3204 = vmatprep.subr.mxu0 %v3643_v1  ;;  %v2658_v51 = vld [vmem:[%s4583_s1 + $0x88] sm:$0xff]  ;;  %v3426_v42 = vld [vmem:[%s4589_s7 + $0x30] sm:$0xff]  }
 0x1f5   : > { %v3498_v54 = vpop.eup %3497  ;;  %v881_v43 = vadd.f32 1.0, %v3496_v52  ;;  %v895_v5 = vpack.c.bf16 %v523_v59, %v522_v58  ;;  %v527_v22 = vmul.f32 %v520_v31, %v3843_v26  ;;  %v528_v36 = vmul.f32 %v520_v31, %v3854_v30  ;;  %v3422_v26 = vld [vmem:[%s4587_s5 + $0x50] sm:$0xff]   ;;  %v3423_v30 = vld [vmem:[%s4587_s5 + $0x48] sm:$0xff]   ;;  %3205 = vmatpush3.msra.mxu0 %v2666_v11  ;;  %v2657_v52 = vld [vmem:[%s4583_s1 + $0x80] sm:$0xff] }
 0x1f6   : > { %v882_v56 = vadd.f32 1.0, %v3498_v54  ;;  %v887_v61 = vmul.f32 0.5, %v879_v55  ;;  %v896_v25 = vpack.c.bf16 %v525_v15, %v524_v14  ;;  %v529_v0 = vmul.f32 %v520_v31, %v3862_v33  ;;  %v3424_v33 = vld [vmem:[%s4587_s5 + $0x40] sm:$0xff]   ;;  %3206 = vmatprep.subr.mxu0 %v3643_v1  ;;  %v3427_v11 = vld [vmem:[%s4589_s7 + $0x28] sm:$0xff]  }
 0x1f7   : > { %v3500_v40 = vpop.eup %3499  ;;  %v889_v2 = vmul.f32 0.5, %v881_v43  ;;  %v897_v34 = vpack.c.bf16 %v527_v22, %v526_v19  ;;  %3207 = vmatpush3.msra.mxu0 %v2665_v44  ;;  %v2640_v31 = vld [vmem:[%s4592_s10] ss:$0 sm:$0xff] }
 0x1f8   : > { %v880_v17 = vadd.f32 1.0, %v3500_v40  ;;  %v890_v62 = vmul.f32 0.5, %v882_v56  ;;  %v898_v37 = vpack.c.bf16 %v529_v0, %v528_v36  ;;  %3208 = vmatprep.subr.mxu0 %v3643_v1  ;;  %v3428_v44 = vld [vmem:[%s4589_s7 + $0x20] sm:$0xff]  }
 0x1f9   : > { %3209 = vmatpush3.msra.mxu0 %v2664_v45  ;;  %v2693_v45 = vld [vmem:[%s4588_s6 + $0x1] ss:$0 sm:$0xff] }
 0x1fa   : > { %v888_v63 = vmul.f32 0.5, %v880_v17  ;;  %v900_v7 = vpack.c.bf16 %v890_v62, %v889_v2  ;;  %3210 = vmatprep.subr.mxu0 %v3643_v1 }
 0x1fb   : > { %v3502_v4 = vpop.eup %3501  ;;  %3211 = vmatpush3.msra.mxu0 %v2663_v46 }
 0x1fc   : > { %v899_v3 = vpack.c.bf16 %v888_v63, %v887_v61  ;;  %v883_v10 = vadd.f32 1.0, %v3502_v4  ;;  %3212 = vmatprep.subr.mxu0 %v3643_v1 }
 0x1fd   : > { %3213 = vmatpush3.msra.mxu0 %v2662_v47 }
 0x1fe   : > { %1070 = vmatprep.mubr.bf16.mxu1 %v899_v3  ;;  %v891_v21 = vmul.f32 0.5, %v883_v10  ;;  %3214 = vmatprep.subr.mxu0 %v3643_v1 }
 0x1ff   : > { %v3504_v9 = vpop.eup %3503  ;;  %1071 = vmatmul.mubr.bf16.vlgmr.msra.gmra.mxu1 %v895_v5  ;;  %3215 = vmatpush3.msra.mxu0 %v2661_v48 }
 0x200   : > { %v884_v13 = vadd.f32 1.0, %v3504_v9  ;;  %1078 = vmatprep.mubr.bf16.mxu1 %v900_v7  ;;  %3228 = vmatpush3.bf16.msra.mxu1 %v4026_v12  ;;  %v3506_v20 = vpop.eup %3505 }
 0x201   : > { %3229 = vmatprep.subr.bf16.mxu1 %v3418_v6  ;;  %v3508_v24 = vpop.eup %3507  ;;  %v886_v27 = vadd.f32 1.0, %v3506_v20  ;;  %3216 = vmatprep.subr.mxu0 %v3643_v1 }
 0x202   : > { %v892_v18 = vmul.f32 0.5, %v884_v13  ;;  %v885_v12 = vadd.f32 1.0, %v3508_v24  ;;  %3217 = vmatpush3.msra.mxu0 %v2660_v49 }
 0x203   : > { %v894_v29 = vmul.f32 0.5, %v886_v27  ;;  %3218 = vmatprep.subr.mxu0 %v3643_v1 }
 0x204   : > { %3230 = vmatpush3.bf16.msra.mxu1 %v3418_v6  ;;  %v901_v28 = vpack.c.bf16 %v892_v18, %v891_v21  ;;  %v893_v32 = vmul.f32 0.5, %v885_v12  ;;  %3219 = vmatpush3.msra.mxu0 %v2659_v50 }
 0x205   : > { %3231 = vmatprep.subr.bf16.mxu1 %v3419_v16  ;;  %3220 = vmatprep.subr.mxu0 %v3643_v1 }
 0x206   : > { %v902_v35 = vpack.c.bf16 %v894_v29, %v893_v32  ;;  %3221 = vmatpush3.msra.mxu0 %v2658_v51 }
 0x207   : > { %1079 = vmatmul.mubr.bf16.gmra.mxu1 %v896_v25  ;;  %3222 = vmatprep.subr.mxu0 %v3643_v1 }
 0x208   : > { %1086 = vmatprep.mubr.bf16.mxu1 %v901_v28  ;;  %3232 = vmatpush3.bf16.msra.mxu1 %v3419_v16 }
 0x209   : > { %3233 = vmatprep.subr.bf16.mxu1 %v3420_v38  ;;  %3223 = vmatpush3.msra.mxu0 %v2657_v52 }
 0x20a   : > { %3251 = vmatprep.subr.bf16.mxu0 %v3425_v57 }
 0x20c   : > { %3234 = vmatpush3.bf16.msra.mxu1 %v3420_v38 }
 0x20d   : > { %3235 = vmatprep.subr.bf16.mxu1 %v3421_v23 }
 0x20f   : > { %1087 = vmatmul.mubr.bf16.gmra.mxu1 %v897_v34 }
 0x210   : > { %1094 = vmatprep.mubr.bf16.mxu1 %v902_v35  ;;  %3236 = vmatpush3.bf16.msra.mxu1 %v3421_v23 }
 0x211   : > { %3237 = vmatprep.subr.bf16.mxu1 %v3422_v26 }
 0x214   : > { %3238 = vmatpush3.bf16.msra.mxu1 %v3422_v26 }
 0x215   : > { %3239 = vmatprep.subr.bf16.mxu1 %v3423_v30 }
 0x217   : > { %1095 = vmatmul.mubr.bf16.gmra.mxu1 %v898_v37 }
 0x218   : > { %3240 = vmatpush3.bf16.msra.mxu1 %v3423_v30 }
 0x219   : > { %3241 = vmatprep.subr.bf16.mxu1 %v3424_v33 }
 0x21c   : > { %3242 = vmatpush3.bf16.msra.mxu1 %v3424_v33 }
 0x21d   : > { %3267 = vmatprep.subr.mxu1 %v3643_v1 }
 0x2bf   : > { %v2939_v53 = vpop.f32.mrf.mxu1 }
 0x2c1   : > { %v2940_v54 = vpop.f32.mrf.mxu1 }
 0x2c2   : > { %v2941_v56 = vadd.f32 %v2940_v54, %v2939_v53 }
 0x2c3   : > { %v2942_v55 = vpop.f32.mrf.mxu1 }
 0x2c4   : > { %v4132_v58 = vadd.f32 %v2941_v56, %v2640_v31 }
 0x2c5   : > { %v2943_v40 = vpop.f32.mrf.mxu1 }
 0x2c6   : > { %v2944_v43 = vadd.f32 %v2943_v40, %v2942_v55 }
 0x2c7   : > { %v2945_v17 = vpop.f32.mrf.mxu1 }
 0x2c8   : > { %v4134_v59 = vadd.f32 %v2944_v43, %v2640_v31 }
 0x2c9   : > { %v2946_v61 = vpop.f32.mrf.mxu1 }
 0x2ca   : > { %v1240_v62 = vpack.c.bf16 %v4134_v59, %v4132_v58  ;;  %v2947_v2 = vadd.f32 %v2946_v61, %v2945_v17  ;;  %v1103_v16 = vadd.f32 %v4134_v59, %v4132_v58 }
 0x2cb   : > { %v2948_v63 = vpop.f32.mrf.mxu1 }
 0x2cc   : > { %3243 = vmatprep.mubr.bf16.mxu1 %v1240_v62  ;;  %v4138_v6 = vadd.f32 %v2947_v2, %v2640_v31 }
 0x2cd   : > { %v2949_v3 = vpop.f32.mrf.mxu1 }
 0x2ce   : > { %v2950_v4 = vadd.f32 %v2949_v3, %v2948_v63  ;;  %v1104_v21 = vadd.f32 %v1103_v16, %v4138_v6 }
 0x2cf   : > { %v2951_v5 = vpop.f32.mrf.mxu1 }
 0x2d0   : > { %v4140_v7 = vadd.f32 %v2950_v4, %v2640_v31 }
 0x2d1   : > { %v2952_v9 = vpop.f32.mrf.mxu1 }
 0x2d2   : > { %v1241_v10 = vpack.c.bf16 %v4140_v7, %v4138_v6  ;;  %v2953_v14 = vadd.f32 %v2952_v9, %v2951_v5  ;;  %v1105_v28 = vadd.f32 %v1104_v21, %v4140_v7 }
 0x2d3   : > { %v2954_v13 = vpop.f32.mrf.mxu1 }
 0x2d4   : > { %3244 = vmatmul.mubr.bf16.vlgmr.msra.gmra.mxu1 %v1241_v10  ;;  %v4147_v24 = vadd.f32 %v2953_v14, %v2640_v31 }
 0x2d5   : > { %v2955_v15 = vpop.f32.mrf.mxu1 }
 0x2d6   : > { %v2956_v18 = vadd.f32 %v2955_v15, %v2954_v13  ;;  %v1106_v29 = vadd.f32 %v1105_v28, %v4147_v24 }
 0x2d7   : > { %v2957_v20 = vpop.f32.mrf.mxu1 }
 0x2d8   : > { %v4149_v25 = vadd.f32 %v2956_v18, %v2640_v31 }
 0x2d9   : > { %v2958_v27 = vpop.f32.mrf.mxu1 }
 0x2da   : > { %v2959_v12 = vadd.f32 %v2958_v27, %v2957_v20  ;;  %v1242_v19 = vpack.c.bf16 %v4149_v25, %v4147_v24  ;;  %v1107_v35 = vadd.f32 %v1106_v29, %v4149_v25 }
 0x2db   : > { %v2960_v22 = vpop.f32.mrf.mxu1 }
 0x2dc   : > { %v4155_v32 = vadd.f32 %v2959_v12, %v2640_v31  ;;  %3247 = vmatprep.mubr.bf16.mxu1 %v1242_v19 }
 0x2dd   : > { %v2961_v34 = vpop.f32.mrf.mxu1 }
 0x2de   : > { %v2962_v36 = vadd.f32 %v2961_v34, %v2960_v22  ;;  %v1108_v0 = vadd.f32 %v1107_v35, %v4155_v32 }
 0x2e0   : > { %v4159_v37 = vadd.f32 %v2962_v36, %v2640_v31 }
 0x2e2   : > { %v1109_v38 = vadd.f32 %v1108_v0, %v4159_v37  ;;  %v1243_v23 = vpack.c.bf16 %v4159_v37, %v4155_v32 }
 0x2e4   : > { %v1110_v26 = vrot.slane %v1109_v38, 4  ;;  %3248 = vmatmul.mubr.bf16.gmra.mxu1 %v1243_v23 }
 0x2e5   : > { %3299 = vmatprep.mubr.msk.f32.mxu1 %vm3644_vm0, %v3643_v1 }
 0x2e6   : > { %v1111_v30 = vadd.f32 %v1110_v26, %v1109_v38 }
 0x2e8   : > { %v1112_v33 = vrot.slane %v1111_v30, 2 }
 0x2ea   : > { %v1113_v60 = vadd.f32 %v1112_v33, %v1111_v30 }
 0x2ec   : > { %v1114_v8 = vrot.slane %v1113_v60, 1 }
 0x2ee   : > { %v1115_v39 = vadd.f32 %v1114_v8, %v1113_v60 }
 0x2f0   : > { %v1116_v41 = vmul.f32 0.015625, %v1115_v39 }
 0x2f2   : > { %3225 = vmatmul.mubr.f32.vlgmr.msra.gmra.mxu0 %v1116_v41 }
 0x2f3   : > { %3252 = vmatpush3.bf16.msra.mxu0 %v3425_v57 }
 0x2f4   : > { %3253 = vmatprep.subr.bf16.mxu0 %v3426_v42 }
 0x2f7   : > { %3254 = vmatpush3.bf16.msra.mxu0 %v3426_v42  ;;  %v2673_v42 = vld [vmem:[%s4584_s2 + $0x1] sm:$0x1] }
 0x2f8   : > { %3255 = vmatprep.subr.bf16.mxu0 %v3427_v11 }
 0x2fb   : > { %3256 = vmatpush3.bf16.msra.mxu0 %v3427_v11 }
 0x2fc   : > { %3257 = vmatprep.subr.bf16.mxu0 %v3428_v44 }
 0x2ff   : > { %3258 = vmatpush3.bf16.msra.mxu0 %v3428_v44 }
 0x394   : > { %v3245_v46 = vpop.f32.mrf.mxu1 }
 0x395   : > { %v4181_v47 = vadd.f32 %v3245_v46, %v2693_v45 }
 0x396   : > { %v1351_v48 = vpop.f32.mrf.mxu1 }
 0x397   : > { %v1392_v49 = vmul.f32 0.044715, %v4181_v47  ;;  %v4184_v50 = vadd.f32 %v2693_v45, %v1351_v48 }
 0x398   : > { %v3246_v51 = vpop.f32.mrf.mxu1 }
 0x399   : > { %v1400_v52 = vmul.f32 %v1392_v49, %v4181_v47  ;;  %v1390_v53 = vmul.f32 0.044715, %v4184_v50  ;;  %v1363_v54 = vadd.f32 %v3246_v51, %v2693_v45 }
 0x39a   : > { %v1354_v55 = vpop.f32.mrf.mxu1 }
 0x39b   : > { %v1408_v56 = vmul.f32 %v1400_v52, %v4181_v47  ;;  %v1398_v31 = vmul.f32 %v1390_v53, %v4184_v50  ;;  %v1393_v40 = vmul.f32 0.044715, %v1363_v54  ;;  %v4190_v43 = vadd.f32 %v2693_v45, %v1354_v55 }
 0x39c   : > { %v1385_v55 = vmul.f32 0.5, %v1363_v54 }
 0x39d   : > { %v1416_v17 = vadd.f32 %v1408_v56, %v4181_v47  ;;  %v1406_v61 = vmul.f32 %v1398_v31, %v4184_v50  ;;  %v1401_v62 = vmul.f32 %v1393_v40, %v1363_v54  ;;  %v1391_v63 = vmul.f32 0.044715, %v4190_v43 }
 0x39f   : > { %v1424_v2 = vmul.f32 0.7978846, %v1416_v17  ;;  %v1414_v3 = vadd.f32 %v1406_v61, %v4184_v50  ;;  %v1409_v4 = vmul.f32 %v1401_v62, %v1363_v54  ;;  %v1399_v5 = vmul.f32 %v1391_v63, %v4190_v43 }
 0x3a1   : > { %v1422_v9 = vmul.f32 0.7978846, %v1414_v3  ;;  %v1417_v10 = vadd.f32 %v1409_v4, %v1363_v54  ;;  %v1407_v13 = vmul.f32 %v1399_v5, %v4190_v43  ;;  %3509 = vtanh.f32 %v1424_v2 }
 0x3a2   : > { %v1382_v2 = vmul.f32 0.5, %v4184_v50  ;;  %v1383_v3 = vmul.f32 0.5, %v4190_v43  ;;  %v1384_v5 = vmul.f32 0.5, %v4181_v47 }
 0x3a3   : > { %v1425_v14 = vmul.f32 0.7978846, %v1417_v10  ;;  %3511 = vtanh.f32 %v1422_v9  ;;  %v1415_v15 = vadd.f32 %v1407_v13, %v4190_v43 }
 0x3a4   : > { %v3249_v16 = vpop.f32.mrf.mxu1 }
 0x3a5   : > { %3513 = vtanh.f32 %v1425_v14  ;;  %v4199_v18 = vadd.f32 %v3249_v16, %v2693_v45  ;;  %v1423_v20 = vmul.f32 0.7978846, %v1415_v15 }
 0x3a6   : > { %v1367_v21 = vpop.f32.mrf.mxu1 }
 0x3a7   : > { %v1396_v27 = vmul.f32 0.044715, %v4199_v18  ;;  %v4202_v28 = vadd.f32 %v2693_v45, %v1367_v21  ;;  %3515 = vtanh.f32 %v1423_v20 }
 0x3a8   : > { %v3250_v12 = vpop.f32.mrf.mxu1 }
 0x3a9   : > { %v1404_v19 = vmul.f32 %v1396_v27, %v4199_v18  ;;  %v1394_v22 = vmul.f32 0.044715, %v4202_v28  ;;  %v1379_v29 = vadd.f32 %v3250_v12, %v2693_v45 }
 0x3aa   : > { %v1370_v34 = vpop.f32.mrf.mxu1 }
 0x3ab   : > { %v1412_v35 = vmul.f32 %v1404_v19, %v4199_v18  ;;  %v1402_v36 = vmul.f32 %v1394_v22, %v4202_v28  ;;  %v1397_v0 = vmul.f32 0.044715, %v1379_v29  ;;  %v1371_v38 = vadd.f32 %v2693_v45, %v1370_v34 }
 0x3ac   : > { %v1389_v34 = vmul.f32 0.5, %v1379_v29 }
 0x3ad   : > { %v1420_v23 = vadd.f32 %v1412_v35, %v4199_v18  ;;  %v1410_v26 = vmul.f32 %v1402_v36, %v4202_v28  ;;  %v1405_v30 = vmul.f32 %v1397_v0, %v1379_v29  ;;  %v1395_v33 = vmul.f32 0.044715, %v1371_v38 }
 0x3ae   : > { %v3510_v41 = vpop.eup %3509  ;;  %v1386_v36 = vmul.f32 0.5, %v4202_v28  ;;  %v1387_v0 = vmul.f32 0.5, %v1371_v38 }
 0x3af   : > { %v1418_v60 = vadd.f32 %v1410_v26, %v4202_v28  ;;  %v1413_v8 = vmul.f32 %v1405_v30, %v1379_v29  ;;  %v1403_v39 = vmul.f32 %v1395_v33, %v1371_v38  ;;  %v1428_v57 = vmul.f32 0.7978846, %v1420_v23  ;;  %v2674_v28 = vld [vmem:[%s4585_s3 + $0x1] sm:$0x1] }
 0x3b0   : > { %v3512_v11 = vpop.eup %3511  ;;  %v1440_v63 = vadd.f32 1.0, %v3510_v41  ;;  %v1388_v26 = vmul.f32 0.5, %v4199_v18 }
 0x3b1   : > { %v1426_v44 = vmul.f32 0.7978846, %v1418_v60  ;;  %v1421_v46 = vadd.f32 %v1413_v8, %v1379_v29  ;;  %v1411_v45 = vmul.f32 %v1403_v39, %v1371_v38  ;;  %v1438_v31 = vadd.f32 1.0, %v3512_v11 }
 0x3b2   : > { %v3514_v48 = vpop.eup %3513  ;;  %v1202_v49 = vpop.f32.mrf.mxu0  ;;  %v1448_v14 = vmul.f32 %v1440_v63, %v1384_v5  ;;  %v3444_v63 = vld [vmem:[%s4591_s9 + $0x80] sm:$0xff]  }
 0x3b3   : > { %3517 = vtanh.f32 %v1426_v44  ;;  %v1429_v51 = vmul.f32 0.7978846, %v1421_v46  ;;  %v1419_v52 = vadd.f32 %v1411_v45, %v1371_v38  ;;  %v1203_v53 = vadd.f32 %v2673_v42, %v1202_v49  ;;  %v3429_v44 = vld [vmem:[%s4591_s9 + $0xf8] sm:$0xff]   ;;  %v3431_v45 = vld [vmem:[%s4591_s9 + $0xf0] sm:$0xff]   ;;  %v3433_v49 = vld [vmem:[%s4591_s9 + $0xe8] sm:$0xff]  }
 0x3b4   : > { %3519 = vtanh.f32 %v1428_v57  ;;  %v3226_v56 = vpop.f32.mrf.mxu0  ;;  %v1441_v40 = vadd.f32 1.0, %v3514_v48  ;;  %v3516_v17 = vpop.eup %3515  ;;  %v1446_v54 = vmul.f32 %v1438_v31, %v1382_v2  ;;  %v3430_v46 = vld [vmem:[%s4591_s9 + $0xb8] sm:$0xff]   ;;  %3000 = vmatprep.subr.bf16.mxu0 %v3429_v44  ;;  %v3432_v48 = vld [vmem:[%s4591_s9 + $0xb0] sm:$0xff]  }
 0x3b5   : > { %3521 = vtanh.f32 %v1429_v51  ;;  %v1427_v61 = vmul.f32 0.7978846, %v1419_v52  ;;  %v1207_v62 = vmul.f32 0.044715, %v1203_v53  ;;  %v1439_v4 = vadd.f32 1.0, %v3516_v17  ;;  %v3434_v51 = vld [vmem:[%s4591_s9 + $0xa8] sm:$0xff]  }
 0x3b6   : > { %v1449_v10 = vmul.f32 %v1441_v40, %v1385_v55  ;;  %v1206_v42 = vmul.f32 0.5, %v1203_v53  ;;  %v3435_v52 = vld [vmem:[%s4591_s9 + $0xe0] sm:$0xff]   ;;  %v3437_v55 = vld [vmem:[%s4591_s9 + $0xd8] sm:$0xff]   ;;  %v3439_v31 = vld [vmem:[%s4591_s9 + $0xd0] sm:$0xff]  }
 0x3b7   : > { %3523 = vtanh.f32 %v1427_v61  ;;  %v1208_v9 = vmul.f32 %v1207_v62, %v1203_v53  ;;  %v1447_v13 = vmul.f32 %v1439_v4, %v1383_v3  ;;  %v3438_v56 = vld [vmem:[%s4591_s9 + $0x98] sm:$0xff]   ;;  %v3440_v40 = vld [vmem:[%s4591_s9 + $0x90] sm:$0xff]   ;;  %v3441_v17 = vld [vmem:[%s4591_s9 + $0xc8] sm:$0xff]  }
 0x3b8   : > { %v1455_v20 = vpack.c.bf16 %v1449_v10, %v1448_v14  ;;  %v3442_v61 = vld [vmem:[%s4591_s9 + $0x88] sm:$0xff]   ;;  %v3443_v62 = vld [vmem:[%s4591_s9 + $0xc0] sm:$0xff]   ;;  %v4278_v2 = vld [vmem:[%s4587_s5 + $0xb8] sm:$0xff]  }
 0x3b9   : > { %v1209_v15 = vmul.f32 %v1208_v9, %v1203_v53  ;;  %v1454_v16 = vpack.c.bf16 %v1447_v13, %v1446_v54  ;;  %v2675_v3 = vld [vmem:[%s4586_s4 + $0x1] sm:$0x1] }
 0x3bb   : > { %v1210_v21 = vadd.f32 %v1209_v15, %v1203_v53  ;;  %3259 = vmatprep.mubr.msk.bf16.mxu0 %vm785_vm1, %v1454_v16  ;;  %v3436_v53 = vld [vmem:[%s4591_s9 + $0xa0] sm:$0xff]  }
 0x3bc   : > { %3260 = vmatmul.mubr.msk.bf16.vlgmr.msra.gmra.mxu0 %vm785_vm1, %v1455_v20  ;;  %v2711_v15 = vld [vmem:[%s4590_s8 + $0x1] ss:$0 sm:$0xff] }
 0x3bd   : > { %v1211_v50 = vmul.f32 0.7978846, %v1210_v21  ;;  %3001 = vmatpush3.bf16.msra.mxu0 %v3430_v46 }
 0x3be   : > { %3002 = vmatprep.subr.bf16.mxu0 %v3431_v45 }
 0x3bf   : > { %3525 = vtanh.f32 %v1211_v50 }
 0x3c0   : > { %v3518_v43 = vpop.eup %3517 }
 0x3c1   : > { %v3520_v27 = vpop.eup %3519  ;;  %v1442_v47 = vadd.f32 1.0, %v3518_v43  ;;  %3003 = vmatpush3.bf16.msra.mxu0 %v3432_v48 }
 0x3c2   : > { %v3522_v12 = vpop.eup %3521  ;;  %v1444_v35 = vadd.f32 1.0, %v3520_v27  ;;  %3004 = vmatprep.subr.bf16.mxu0 %v3433_v49 }
 0x3c3   : > { %v1445_v19 = vadd.f32 1.0, %v3522_v12  ;;  %v1450_v33 = vmul.f32 %v1442_v47, %v1386_v36 }
 0x3c4   : > { %v3524_v22 = vpop.eup %3523  ;;  %v1452_v8 = vmul.f32 %v1444_v35, %v1388_v26 }
 0x3c5   : > { %v1443_v23 = vadd.f32 1.0, %v3524_v22  ;;  %v1453_v30 = vmul.f32 %v1445_v19, %v1389_v34  ;;  %3005 = vmatpush3.bf16.msra.mxu0 %v3434_v51 }
 0x3c6   : > { %3006 = vmatprep.subr.bf16.mxu0 %v3435_v52 }
 0x3c7   : > { %v1451_v60 = vmul.f32 %v1443_v23, %v1387_v0  ;;  %v1457_v41 = vpack.c.bf16 %v1453_v30, %v1452_v8 }
 0x3c9   : > { %v1456_v39 = vpack.c.bf16 %v1451_v60, %v1450_v33  ;;  %3007 = vmatpush3.bf16.msra.mxu0 %v3436_v53 }
 0x3ca   : > { %3008 = vmatprep.subr.bf16.mxu0 %v3437_v55 }
 0x3cb   : > { %3263 = vmatprep.mubr.msk.bf16.mxu0 %vm785_vm1, %v1456_v39 }
 0x3cc   : > { %v3526_v57 = vpop.eup %3525  ;;  %3264 = vmatmul.mubr.msk.bf16.gmra.mxu0 %vm785_vm1, %v1457_v41 }
 0x3cd   : > { %v1213_v29 = vadd.f32 1.0, %v3526_v57  ;;  %3009 = vmatpush3.bf16.msra.mxu0 %v3438_v56 }
 0x3ce   : > { %3010 = vmatprep.subr.bf16.mxu0 %v3439_v31 }
 0x3cf   : > { %v1214_v38 = vmul.f32 %v1213_v29, %v1206_v42 }
 0x3d1   : > { %v1217_v11 = vmul.f32 %v2674_v28, %v1214_v38  ;;  %3011 = vmatpush3.bf16.msra.mxu0 %v3440_v40 }
 0x3d2   : > { %3012 = vmatprep.subr.bf16.mxu0 %v3441_v17 }
 0x3d3   : > { %v1218_v18 = vsel %vm508_vm2, %v1217_v11, 0.0 }
 0x3d4   : > { %1219 = vadd.xlane.f32.xlu0 %v1218_v18 }
 0x3d5   : > { %3013 = vmatpush3.bf16.msra.mxu0 %v3442_v61  ;;  %v3446_v61 = vld [vmem:[%s4587_s5 + $0xb0] sm:$0xff]  }
 0x3d6   : > { %3014 = vmatprep.subr.bf16.mxu0 %v3443_v62 }
 0x3d9   : > { %3015 = vmatpush3.bf16.msra.mxu0 %v3444_v63 }
 0x3da   : > { %3302 = vmatprep.subr.bf16.mxu0 %v4278_v2 }
 0x45d   : > { %v1220_v4 = vpop.xlane.xlu0 %1219 }
 0x45e   : > { %v1223_v5 = vadd.f32 %v2675_v3, %v1220_v4 }
 0x460   : > { %v1224_v9 = vmul.f32 0.5, %v1223_v5 }
 0x462   : > { %3527 = vtanh.f32 %v1224_v9 }
 0x46f   : > { %v3528_v10 = vpop.eup %3527 }
 0x470   : > { %v1226_v54 = vadd.f32 1.0, %v3528_v10 }
 0x472   : > { %v1227_v13 = vmul.f32 0.5, %v1226_v54 }
 0x474   : > { %3344 = vpush %v1227_v13 }
 0x47c   : > { %v3261_v14 = vpop.f32.mrf.mxu0 }
 0x47d   : > { %v1554_v19 = vadd.f32 %v3261_v14, %v2711_v15 }
 0x47e   : > { %v1545_v16 = vpop.f32.mrf.mxu0 }
 0x47f   : > { %v1546_v20 = vadd.f32 %v2711_v15, %v1545_v16  ;;  %v1578_v36 = vmul.f32 0.5, %v1554_v19  ;;  %v2785_v19 = vld [vmem:[%s4583_s1 + $0x178] sm:$0xff] }
 0x480   : > { %v3262_v21 = vpop.f32.mrf.mxu0  ;;  %3268 = vmatpush3.msra.mxu1 %v2785_v19 }
 0x481   : > { %v1576_v50 = vmul.f32 0.5, %v1546_v20  ;;  %v1557_v47 = vadd.f32 %v3262_v21, %v2711_v15  ;;  %3269 = vmatprep.subr.mxu1 %v3643_v1 }
 0x482   : > { %v1548_v43 = vpop.f32.mrf.mxu0 }
 0x483   : > { %3529 = vtanh.f32 %v1576_v50  ;;  %v1549_v27 = vadd.f32 %v2711_v15, %v1548_v43  ;;  %v1579_v34 = vmul.f32 0.5, %v1557_v47  ;;  %v3448_v47 = vld [vmem:[%s4587_s5 + $0xa0] sm:$0xff]  }
 0x485   : > { %v1577_v12 = vmul.f32 0.5, %v1549_v27 }
 0x487   : > { %3531 = vtanh.f32 %v1577_v12 }
 0x488   : > { %3533 = vtanh.f32 %v1579_v34  ;;  %v2783_v34 = vld [vmem:[%s4583_s1 + $0x168] sm:$0xff] }
 0x489   : > { %3535 = vtanh.f32 %v1578_v36  ;;  %v2781_v36 = vld [vmem:[%s4583_s1 + $0x158] sm:$0xff] }
 0x48c   : > { %v3265_v22 = vpop.f32.mrf.mxu0 }
 0x48d   : > { %v1570_v11 = vadd.f32 %v3265_v22, %v2711_v15  ;;  %v2784_v22 = vld [vmem:[%s4583_s1 + $0x170] sm:$0xff] }
 0x48e   : > { %v1561_v35 = vpop.f32.mrf.mxu0  ;;  %3270 = vmatpush3.msra.mxu1 %v2784_v22 }
 0x48f   : > { %v1562_v60 = vadd.f32 %v2711_v15, %v1561_v35  ;;  %v1582_v46 = vmul.f32 0.5, %v1570_v11  ;;  %3271 = vmatprep.subr.mxu1 %v3643_v1  ;;  %v2782_v35 = vld [vmem:[%s4583_s1 + $0x160] sm:$0xff] }
 0x490   : > { %v3266_v0 = vpop.f32.mrf.mxu0  ;;  %v3530_v23 = vpop.eup %3529  ;;  %3272 = vmatpush3.msra.mxu1 %v2783_v34 }
 0x491   : > { %v1592_v33 = vadd.f32 1.0, %v3530_v23  ;;  %v1580_v29 = vmul.f32 0.5, %v1562_v60  ;;  %v1573_v28 = vadd.f32 %v3266_v0, %v2711_v15  ;;  %3273 = vmatprep.subr.mxu1 %v3643_v1  ;;  %v2780_v0 = vld [vmem:[%s4583_s1 + $0x150] sm:$0xff]  ;;  %v2779_v23 = vld [vmem:[%s4583_s1 + $0x148] sm:$0xff] }
 0x492   : > { %v1564_v26 = vpop.f32.mrf.mxu0  ;;  %3274 = vmatpush3.msra.mxu1 %v2782_v35  ;;  %v2775_v60 = vld [vmem:[%s4583_s1 + $0x128] sm:$0xff]  ;;  %v3453_v35 = vld [vmem:[%s4589_s7 + $0x58] sm:$0xff]  }
 0x493   : > { %v1565_v30 = vadd.f32 %v2711_v15, %v1564_v26  ;;  %v1600_v57 = vmul.f32 0.5, %v1592_v33  ;;  %v1583_v18 = vmul.f32 0.5, %v1573_v28  ;;  %3275 = vmatprep.subr.mxu1 %v3643_v1  ;;  %v2778_v26 = vld [vmem:[%s4583_s1 + $0x140] sm:$0xff]  ;;  %v2776_v33 = vld [vmem:[%s4583_s1 + $0x130] sm:$0xff] }
 0x494   : > { %v3532_v8 = vpop.eup %3531  ;;  %3276 = vmatpush3.msra.mxu1 %v2781_v36  ;;  %v3454_v36 = vld [vmem:[%s4589_s7 + $0x50] sm:$0xff]  }
 0x495   : > { %v1593_v39 = vadd.f32 1.0, %v3532_v8  ;;  %v1581_v41 = vmul.f32 0.5, %v1565_v30  ;;  %v3534_v44 = vpop.eup %3533  ;;  %3277 = vmatprep.subr.mxu1 %v3643_v1  ;;  %v2777_v30 = vld [vmem:[%s4583_s1 + $0x138] sm:$0xff]  ;;  %v2774_v8 = vld [vmem:[%s4583_s1 + $0x120] sm:$0xff] }
 0x496   : > { %v3536_v45 = vpop.eup %3535  ;;  %v1595_v48 = vadd.f32 1.0, %v3534_v44  ;;  %3278 = vmatpush3.msra.mxu1 %v2780_v0  ;;  %v3455_v0 = vld [vmem:[%s4589_s7 + $0x48] sm:$0xff]  }
 0x497   : > { %v1601_v42 = vmul.f32 0.5, %v1593_v39  ;;  %3537 = vtanh.f32 %v1581_v41  ;;  %v1594_v49 = vadd.f32 1.0, %v3536_v45  ;;  %3279 = vmatprep.subr.mxu1 %v3643_v1  ;;  %v2773_v39 = vld [vmem:[%s4583_s1 + $0x118] sm:$0xff]  ;;  %v2772_v41 = vld [vmem:[%s4583_s1 + $0x110] sm:$0xff] }
 0x498   : > { %3539 = vtanh.f32 %v1580_v29  ;;  %v1603_v51 = vmul.f32 0.5, %v1595_v48  ;;  %3280 = vmatpush3.msra.mxu1 %v2779_v23  ;;  %v3456_v23 = vld [vmem:[%s4589_s7 + $0x40] sm:$0xff]  }
 0x499   : > { %v1612_v38 = vpack.c.bf16 %v1601_v42, %v1600_v57  ;;  %3541 = vtanh.f32 %v1583_v18  ;;  %v1602_v31 = vmul.f32 0.5, %v1594_v49  ;;  %3281 = vmatprep.subr.mxu1 %v3643_v1  ;;  %v2771_v57 = vld [vmem:[%s4583_s1 + $0x108] sm:$0xff]  ;;  %v2770_v42 = vld [vmem:[%s4583_s1 + $0x100] sm:$0xff] }
 0x49a   : > { %3543 = vtanh.f32 %v1582_v46  ;;  %3282 = vmatpush3.msra.mxu1 %v2778_v26  ;;  %v2753_v18 = vld [vmem:[%s4592_s10 + $0x1] ss:$0 sm:$0xff]  ;;  %v2806_v26 = vld [vmem:[%s4588_s6 + $0x2] ss:$0 sm:$0xff] }
 0x49b   : > { %1785 = vmatprep.mubr.bf16.mxu0 %v1612_v38  ;;  %v1613_v63 = vpack.c.bf16 %v1603_v51, %v1602_v31  ;;  %3283 = vmatprep.subr.mxu1 %v3643_v1 }
 0x49c   : > { %3284 = vmatpush3.msra.mxu1 %v2777_v30 }
 0x49d   : > { %3285 = vmatprep.subr.mxu1 %v3643_v1 }
 0x49e   : > { %3286 = vmatpush3.msra.mxu1 %v2776_v33 }
 0x49f   : > { %3287 = vmatprep.subr.mxu1 %v3643_v1 }
 0x4a0   : > { %3288 = vmatpush3.msra.mxu1 %v2775_v60 }
 0x4a1   : > { %3289 = vmatprep.subr.mxu1 %v3643_v1 }
 0x4a2   : > { %3290 = vmatpush3.msra.mxu1 %v2774_v8 }
 0x4a3   : > { %3291 = vmatprep.subr.mxu1 %v3643_v1 }
 0x4a4   : > { %v3538_v53 = vpop.eup %3537  ;;  %3292 = vmatpush3.msra.mxu1 %v2773_v39 }
 0x4a5   : > { %s3345_s30 = spop %3344  ;;  %v3540_v40 = vpop.eup %3539  ;;  %v1597_v62 = vadd.f32 1.0, %v3538_v53  ;;  %3293 = vmatprep.subr.mxu1 %v3643_v1 }
 0x4a6   : > { %v1230_v52 = vstv %s3345_s30  ;;  %v1596_v3 = vadd.f32 1.0, %v3540_v40  ;;  %v3542_v9 = vpop.eup %3541  ;;  %3294 = vmatpush3.msra.mxu1 %v2772_v41 }
 0x4a7   : > { %v1232_v55 = vmul.f32 %v1230_v52, %v4132_v58  ;;  %v1233_v56 = vmul.f32 %v1230_v52, %v4134_v59  ;;  %v1234_v4 = vmul.f32 %v1230_v52, %v4138_v6  ;;  %v1235_v58 = vmul.f32 %v1230_v52, %v4140_v7  ;;  %v3447_v59 = vld [vmem:[%s4587_s5 + $0xa8] sm:$0xff]   ;;  %v3544_v54 = vpop.eup %3543  ;;  %3295 = vmatprep.subr.mxu1 %v3643_v1 }
 0x4a8   : > { %v1605_v5 = vmul.f32 0.5, %v1597_v62  ;;  %v1604_v10 = vmul.f32 0.5, %v1596_v3  ;;  %v1599_v14 = vadd.f32 1.0, %v3542_v9  ;;  %v1236_v6 = vmul.f32 %v1230_v52, %v4147_v24  ;;  %v3449_v24 = vld [vmem:[%s4587_s5 + $0x98] sm:$0xff]   ;;  %3296 = vmatpush3.msra.mxu1 %v2771_v57 }
 0x4a9   : > { %v1608_v17 = vpack.c.bf16 %v1233_v56, %v1232_v55  ;;  %v1609_v13 = vpack.c.bf16 %v1235_v58, %v1234_v4  ;;  %v1237_v7 = vmul.f32 %v1230_v52, %v4149_v25  ;;  %v1238_v43 = vmul.f32 %v1230_v52, %v4155_v32  ;;  %v3450_v25 = vld [vmem:[%s4587_s5 + $0x90] sm:$0xff]   ;;  %v3451_v32 = vld [vmem:[%s4587_s5 + $0x88] sm:$0xff]   ;;  %3297 = vmatprep.subr.mxu1 %v3643_v1 }
 0x4aa   : > { %v1614_v15 = vpack.c.bf16 %v1605_v5, %v1604_v10  ;;  %v1607_v16 = vmul.f32 0.5, %v1599_v14  ;;  %v1239_v27 = vmul.f32 %v1230_v52, %v4159_v37  ;;  %v3452_v37 = vld [vmem:[%s4587_s5 + $0x80] sm:$0xff]   ;;  %3298 = vmatpush3.msra.mxu1 %v2770_v42 }
 0x4ab   : > { %1786 = vmatmul.mubr.bf16.vlgmr.msra.gmra.mxu0 %v1608_v17  ;;  %v1610_v21 = vpack.c.bf16 %v1237_v7, %v1236_v6 }
 0x4ac   : > { %1793 = vmatprep.mubr.bf16.mxu0 %v1613_v63  ;;  %3303 = vmatpush3.bf16.msra.mxu0 %v4278_v2  ;;  %v1598_v2 = vadd.f32 1.0, %v3544_v54  ;;  %v1611_v12 = vpack.c.bf16 %v1239_v27, %v1238_v43 }
 0x4ad   : > { %3304 = vmatprep.subr.bf16.mxu0 %v3446_v61 }
 0x4ae   : > { %v1606_v20 = vmul.f32 0.5, %v1598_v2 }
 0x4b0   : > { %3305 = vmatpush3.bf16.msra.mxu0 %v3446_v61  ;;  %v1615_v50 = vpack.c.bf16 %v1607_v16, %v1606_v20 }
 0x4b1   : > { %3306 = vmatprep.subr.bf16.mxu0 %v3447_v59 }
 0x4b3   : > { %1794 = vmatmul.mubr.bf16.gmra.mxu0 %v1609_v13 }
 0x4b4   : > { %1801 = vmatprep.mubr.bf16.mxu0 %v1614_v15  ;;  %3307 = vmatpush3.bf16.msra.mxu0 %v3447_v59 }
 0x4b5   : > { %3308 = vmatprep.subr.bf16.mxu0 %v3448_v47 }
 0x4b8   : > { %3309 = vmatpush3.bf16.msra.mxu0 %v3448_v47 }
 0x4b9   : > { %3310 = vmatprep.subr.bf16.mxu0 %v3449_v24 }
 0x4bb   : > { %1802 = vmatmul.mubr.bf16.gmra.mxu0 %v1610_v21 }
 0x4bc   : > { %1809 = vmatprep.mubr.bf16.mxu0 %v1615_v50  ;;  %3311 = vmatpush3.bf16.msra.mxu0 %v3449_v24 }
 0x4bd   : > { %3312 = vmatprep.subr.bf16.mxu0 %v3450_v25 }
 0x4c0   : > { %3313 = vmatpush3.bf16.msra.mxu0 %v3450_v25 }
 0x4c1   : > { %3314 = vmatprep.subr.bf16.mxu0 %v3451_v32 }
 0x4c3   : > { %1810 = vmatmul.mubr.bf16.gmra.mxu0 %v1611_v12 }
 0x4c4   : > { %3315 = vmatpush3.bf16.msra.mxu0 %v3451_v32 }
 0x4c5   : > { %3316 = vmatprep.subr.bf16.mxu0 %v3452_v37 }
 0x4c8   : > { %3317 = vmatpush3.bf16.msra.mxu0 %v3452_v37 }
 0x4c9   : > { %3326 = vmatprep.subr.bf16.mxu0 %v3453_v35 }
 0x56b   : > { %v3016_v29 = vpop.f32.mrf.mxu0 }
 0x56d   : > { %v3017_v28 = vpop.f32.mrf.mxu0 }
 0x56e   : > { %v3018_v11 = vadd.f32 %v3017_v28, %v3016_v29 }
 0x56f   : > { %v3019_v38 = vpop.f32.mrf.mxu0 }
 0x570   : > { %v4383_v48 = vadd.f32 %v3018_v11, %v2753_v18 }
 0x571   : > { %v3020_v44 = vpop.f32.mrf.mxu0 }
 0x572   : > { %v3021_v46 = vadd.f32 %v3020_v44, %v3019_v38 }
 0x573   : > { %v3022_v45 = vpop.f32.mrf.mxu0 }
 0x574   : > { %v4385_v49 = vadd.f32 %v3021_v46, %v2753_v18 }
 0x575   : > { %v3023_v51 = vpop.f32.mrf.mxu0 }
 0x576   : > { %v1955_v1 = vpack.c.bf16 %v4385_v49, %v4383_v48  ;;  %v3024_v53 = vadd.f32 %v3023_v51, %v3022_v45  ;;  %v1818_v58 = vadd.f32 %v4385_v49, %v4383_v48 }
 0x577   : > { %v3025_v52 = vpop.f32.mrf.mxu0 }
 0x578   : > { %3318 = vmatprep.mubr.bf16.mxu0 %v1955_v1  ;;  %v4389_v40 = vadd.f32 %v3024_v53, %v2753_v18 }
 0x579   : > { %v3026_v55 = vpop.f32.mrf.mxu0 }
 0x57a   : > { %v3027_v56 = vadd.f32 %v3026_v55, %v3025_v52  ;;  %v1819_v9 = vadd.f32 %v1818_v58, %v4389_v40 }
 0x57b   : > { %v3028_v31 = vpop.f32.mrf.mxu0 }
 0x57c   : > { %v4391_v17 = vadd.f32 %v3027_v56, %v2753_v18 }
 0x57d   : > { %v3029_v61 = vpop.f32.mrf.mxu0 }
 0x57e   : > { %v1956_v62 = vpack.c.bf16 %v4391_v17, %v4389_v40  ;;  %v3030_v3 = vadd.f32 %v3029_v61, %v3028_v31  ;;  %v1820_v14 = vadd.f32 %v1819_v9, %v4391_v17 }
 0x57f   : > { %v3031_v63 = vpop.f32.mrf.mxu0 }
 0x580   : > { %3319 = vmatmul.mubr.bf16.vlgmr.msra.gmra.mxu0 %v1956_v62  ;;  %v4398_v10 = vadd.f32 %v3030_v3, %v2753_v18 }
 0x581   : > { %v3032_v4 = vpop.f32.mrf.mxu0  ;;  %3327 = vmatpush3.bf16.msra.mxu0 %v3453_v35  ;;  %v2786_v35 = vld [vmem:[%s4584_s2 + $0x2] sm:$0x1] }
 0x582   : > { %v3033_v59 = vadd.f32 %v3032_v4, %v3031_v63  ;;  %v1821_v7 = vadd.f32 %v1820_v14, %v4398_v10  ;;  %3328 = vmatprep.subr.bf16.mxu0 %v3454_v36 }
 0x583   : > { %v3034_v5 = vpop.f32.mrf.mxu0 }
 0x584   : > { %v4400_v54 = vadd.f32 %v3033_v59, %v2753_v18 }
 0x585   : > { %v3035_v13 = vpop.f32.mrf.mxu0  ;;  %3329 = vmatpush3.bf16.msra.mxu0 %v3454_v36 }
 0x586   : > { %v3036_v15 = vadd.f32 %v3035_v13, %v3034_v5  ;;  %v1957_v2 = vpack.c.bf16 %v4400_v54, %v4398_v10  ;;  %v1822_v21 = vadd.f32 %v1821_v7, %v4400_v54  ;;  %3330 = vmatprep.subr.bf16.mxu0 %v3455_v0 }
 0x587   : > { %v3037_v6 = vpop.f32.mrf.mxu0 }
 0x588   : > { %v4406_v16 = vadd.f32 %v3036_v15, %v2753_v18  ;;  %3322 = vmatprep.mubr.bf16.mxu0 %v1957_v2 }
 0x589   : > { %v3038_v20 = vpop.f32.mrf.mxu0  ;;  %3331 = vmatpush3.bf16.msra.mxu0 %v3455_v0 }
 0x58a   : > { %v3039_v50 = vadd.f32 %v3038_v20, %v3037_v6  ;;  %v1823_v43 = vadd.f32 %v1822_v21, %v4406_v16  ;;  %3332 = vmatprep.subr.bf16.mxu0 %v3456_v23 }
 0x58c   : > { %v4410_v27 = vadd.f32 %v3039_v50, %v2753_v18 }
 0x58d   : > { %3333 = vmatpush3.bf16.msra.mxu0 %v3456_v23 }
 0x58e   : > { %v1824_v12 = vadd.f32 %v1823_v43, %v4410_v27  ;;  %v1958_v47 = vpack.c.bf16 %v4410_v27, %v4406_v16 }
 0x590   : > { %v1825_v24 = vrot.slane %v1824_v12, 4  ;;  %3323 = vmatmul.mubr.bf16.gmra.mxu0 %v1958_v47 }
 0x592   : > { %v1826_v25 = vadd.f32 %v1825_v24, %v1824_v12 }
 0x594   : > { %v1827_v32 = vrot.slane %v1826_v25, 2 }
 0x596   : > { %v1828_v37 = vadd.f32 %v1827_v32, %v1826_v25 }
 0x598   : > { %v1829_v19 = vrot.slane %v1828_v37, 1 }
 0x59a   : > { %v1830_v22 = vadd.f32 %v1829_v19, %v1828_v37 }
 0x59c   : > { %v1831_v34 = vmul.f32 0.015625, %v1830_v22 }
 0x59e   : > { %3300 = vmatmul.mubr.f32.vlgmr.msra.gmra.mxu1 %v1831_v34 }
 0x640   : > { %v3320_v30 = vpop.f32.mrf.mxu0 }
 0x641   : > { %v4430_v33 = vadd.f32 %v3320_v30, %v2806_v26 }
 0x642   : > { %v2066_v60 = vpop.f32.mrf.mxu0 }
 0x643   : > { %v2107_v8 = vmul.f32 0.044715, %v4430_v33  ;;  %v4433_v39 = vadd.f32 %v2806_v26, %v2066_v60 }
 0x644   : > { %v3321_v41 = vpop.f32.mrf.mxu0 }
 0x645   : > { %v2115_v57 = vmul.f32 %v2107_v8, %v4430_v33  ;;  %v2105_v42 = vmul.f32 0.044715, %v4433_v39  ;;  %v4437_v29 = vadd.f32 %v3321_v41, %v2806_v26 }
 0x646   : > { %v2069_v28 = vpop.f32.mrf.mxu0 }
 0x647   : > { %v2123_v38 = vmul.f32 %v2115_v57, %v4430_v33  ;;  %v2113_v11 = vmul.f32 %v2105_v42, %v4433_v39  ;;  %v2108_v18 = vmul.f32 0.044715, %v4437_v29  ;;  %v4442_v44 = vadd.f32 %v2806_v26, %v2069_v28 }
 0x649   : > { %v2131_v46 = vadd.f32 %v2123_v38, %v4430_v33  ;;  %v2121_v45 = vmul.f32 %v2113_v11, %v4433_v39  ;;  %v2116_v51 = vmul.f32 %v2108_v18, %v4437_v29  ;;  %v2106_v1 = vmul.f32 0.044715, %v4442_v44 }
 0x64b   : > { %v2139_v52 = vmul.f32 0.7978846, %v2131_v46  ;;  %v2129_v53 = vadd.f32 %v2121_v45, %v4433_v39  ;;  %v2124_v55 = vmul.f32 %v2116_v51, %v4437_v29  ;;  %v2114_v56 = vmul.f32 %v2106_v1, %v4442_v44 }
 0x64c   : > { %v2100_v46 = vmul.f32 0.5, %v4437_v29  ;;  %v2097_v1 = vmul.f32 0.5, %v4433_v39 }
 0x64d   : > { %v2137_v31 = vmul.f32 0.7978846, %v2129_v53  ;;  %v2132_v61 = vadd.f32 %v2124_v55, %v4437_v29  ;;  %v2122_v62 = vmul.f32 %v2114_v56, %v4442_v44  ;;  %3545 = vtanh.f32 %v2139_v52 }
 0x64e   : > { %v2098_v52 = vmul.f32 0.5, %v4442_v44  ;;  %v2099_v55 = vmul.f32 0.5, %v4430_v33 }
 0x64f   : > { %v2140_v63 = vmul.f32 0.7978846, %v2132_v61  ;;  %3547 = vtanh.f32 %v2137_v31  ;;  %v2130_v3 = vadd.f32 %v2122_v62, %v4442_v44 }
 0x650   : > { %v3324_v4 = vpop.f32.mrf.mxu0 }
 0x651   : > { %3549 = vtanh.f32 %v2140_v63  ;;  %v4454_v58 = vadd.f32 %v3324_v4, %v2806_v26  ;;  %v2138_v59 = vmul.f32 0.7978846, %v2130_v3 }
 0x652   : > { %v2082_v5 = vpop.f32.mrf.mxu0 }
 0x653   : > { %v2111_v9 = vmul.f32 0.044715, %v4454_v58  ;;  %v4457_v13 = vadd.f32 %v2806_v26, %v2082_v5  ;;  %3551 = vtanh.f32 %v2138_v59 }
 0x654   : > { %v3325_v14 = vpop.f32.mrf.mxu0 }
 0x655   : > { %v2119_v15 = vmul.f32 %v2111_v9, %v4454_v58  ;;  %v2109_v2 = vmul.f32 0.044715, %v4457_v13  ;;  %v2094_v6 = vadd.f32 %v3325_v14, %v2806_v26 }
 0x656   : > { %v2085_v7 = vpop.f32.mrf.mxu0 }
 0x657   : > { %v2127_v20 = vmul.f32 %v2119_v15, %v4454_v58  ;;  %v2117_v21 = vmul.f32 %v2109_v2, %v4457_v13  ;;  %v2112_v50 = vmul.f32 0.044715, %v2094_v6  ;;  %v2086_v43 = vadd.f32 %v2806_v26, %v2085_v7 }
 0x658   : > { %v2104_v2 = vmul.f32 0.5, %v2094_v6 }
 0x659   : > { %v2135_v12 = vadd.f32 %v2127_v20, %v4454_v58  ;;  %v2125_v47 = vmul.f32 %v2117_v21, %v4457_v13  ;;  %v2120_v24 = vmul.f32 %v2112_v50, %v2094_v6  ;;  %v2110_v25 = vmul.f32 0.044715, %v2086_v43 }
 0x65a   : > { %v3546_v22 = vpop.eup %3545  ;;  %v2101_v20 = vmul.f32 0.5, %v4457_v13  ;;  %v2102_v21 = vmul.f32 0.5, %v2086_v43 }
 0x65b   : > { %v2143_v32 = vmul.f32 0.7978846, %v2135_v12  ;;  %v2133_v37 = vadd.f32 %v2125_v47, %v4457_v13  ;;  %v2128_v19 = vmul.f32 %v2120_v24, %v2094_v6  ;;  %v2118_v34 = vmul.f32 %v2110_v25, %v2086_v43  ;;  %v2787_v13 = vld [vmem:[%s4585_s3 + $0x2] sm:$0x1] }
 0x65c   : > { %v3548_v36 = vpop.eup %3547  ;;  %v2155_v18 = vadd.f32 1.0, %v3546_v22  ;;  %v2103_v12 = vmul.f32 0.5, %v4454_v58 }
 0x65d   : > { %v2141_v0 = vmul.f32 0.7978846, %v2133_v37  ;;  %v2136_v23 = vadd.f32 %v2128_v19, %v2094_v6  ;;  %v2126_v30 = vmul.f32 %v2118_v34, %v2086_v43  ;;  %3553 = vtanh.f32 %v2143_v32 }
 0x65e   : > { %v3550_v26 = vpop.eup %3549  ;;  %v1917_v60 = vpop.f32.mrf.mxu1  ;;  %v2153_v38 = vadd.f32 1.0, %v3548_v36  ;;  %v2163_v63 = vmul.f32 %v2155_v18, %v2099_v55  ;;  %v3457_v36 = vld [vmem:[%s4591_s9 + $0x178] sm:$0xff]   ;;  %v3470_v18 = vld [vmem:[%s4591_s9 + $0x108] sm:$0xff]  }
 0x65f   : > { %v2156_v8 = vadd.f32 1.0, %v3550_v26  ;;  %v2144_v41 = vmul.f32 0.7978846, %v2136_v23  ;;  %v1918_v57 = vadd.f32 %v2786_v35, %v1917_v60  ;;  %3555 = vtanh.f32 %v2141_v0  ;;  %v3458_v0 = vld [vmem:[%s4591_s9 + $0x138] sm:$0xff]   ;;  %3077 = vmatprep.subr.bf16.mxu1 %v3457_v36  ;;  %v3459_v23 = vld [vmem:[%s4591_s9 + $0x170] sm:$0xff]   ;;  %v3462_v60 = vld [vmem:[%s4591_s9 + $0x128] sm:$0xff]  }
 0x660   : > { %v2134_v42 = vadd.f32 %v2126_v30, %v2086_v43  ;;  %v3301_v28 = vpop.f32.mrf.mxu1  ;;  %v3552_v11 = vpop.eup %3551  ;;  %v2161_v61 = vmul.f32 %v2153_v38, %v2097_v1  ;;  %3078 = vmatpush3.bf16.msra.mxu1 %v3458_v0  ;;  %v3460_v26 = vld [vmem:[%s4591_s9 + $0x130] sm:$0xff]   ;;  %v3461_v30 = vld [vmem:[%s4591_s9 + $0x168] sm:$0xff]  }
 0x661   : > { %3557 = vtanh.f32 %v2144_v41  ;;  %v1922_v45 = vmul.f32 0.044715, %v1918_v57  ;;  %v2154_v53 = vadd.f32 1.0, %v3552_v11  ;;  %v2164_v56 = vmul.f32 %v2156_v8, %v2100_v46  ;;  %3079 = vmatprep.subr.bf16.mxu1 %v3459_v23  ;;  %v3463_v8 = vld [vmem:[%s4591_s9 + $0x160] sm:$0xff]   ;;  %v3467_v28 = vld [vmem:[%s4591_s9 + $0x150] sm:$0xff]   ;;  %v3469_v11 = vld [vmem:[%s4591_s9 + $0x148] sm:$0xff]  }
 0x662   : > { %v2142_v51 = vmul.f32 0.7978846, %v2134_v42  ;;  %v1921_v34 = vmul.f32 0.5, %v1918_v57  ;;  %v3464_v41 = vld [vmem:[%s4591_s9 + $0x120] sm:$0xff]   ;;  %v3466_v42 = vld [vmem:[%s4591_s9 + $0x118] sm:$0xff]   ;;  %v3468_v38 = vld [vmem:[%s4591_s9 + $0x110] sm:$0xff]  }
 0x663   : > { %v1923_v31 = vmul.f32 %v1922_v45, %v1918_v57  ;;  %v2162_v62 = vmul.f32 %v2154_v53, %v2098_v52  ;;  %v2170_v59 = vpack.c.bf16 %v2164_v56, %v2163_v63  ;;  %v3471_v46 = vld [vmem:[%s4591_s9 + $0x140] sm:$0xff]  }
 0x664   : > { %3559 = vtanh.f32 %v2142_v51  ;;  %3080 = vmatpush3.bf16.msra.mxu1 %v3460_v26  ;;  %v3472_v45 = vld [vmem:[%s4591_s9 + $0x100] sm:$0xff]  }
 0x665   : > { %v1924_v3 = vmul.f32 %v1923_v31, %v1918_v57  ;;  %v2169_v4 = vpack.c.bf16 %v2162_v62, %v2161_v61  ;;  %3081 = vmatprep.subr.bf16.mxu1 %v3461_v30  ;;  %v2788_v51 = vld [vmem:[%s4586_s4 + $0x2] sm:$0x1] }
 0x666   : > { %v2824_v62 = vld [vmem:[%s4590_s8 + $0x2] ss:$0 sm:$0xff] }
 0x667   : > { %v1925_v29 = vadd.f32 %v1924_v3, %v1918_v57  ;;  %3334 = vmatprep.mubr.msk.bf16.mxu0 %vm785_vm1, %v2169_v4  ;;  %v3465_v57 = vld [vmem:[%s4591_s9 + $0x158] sm:$0xff]  }
 0x668   : > { %3335 = vmatmul.mubr.msk.bf16.vlgmr.msra.gmra.mxu0 %vm785_vm1, %v2170_v59  ;;  %3082 = vmatpush3.bf16.msra.mxu1 %v3462_v60 }
 0x669   : > { %v1926_v39 = vmul.f32 0.7978846, %v1925_v29  ;;  %3083 = vmatprep.subr.bf16.mxu1 %v3463_v8 }
 0x66a   : > { %v3554_v44 = vpop.eup %3553 }
 0x66b   : > { %3561 = vtanh.f32 %v1926_v39  ;;  %v2159_v7 = vadd.f32 1.0, %v3554_v44 }
 0x66c   : > { %v3556_v5 = vpop.eup %3555  ;;  %3084 = vmatpush3.bf16.msra.mxu1 %v3464_v41 }
 0x66d   : > { %v2157_v14 = vadd.f32 1.0, %v3556_v5  ;;  %v2167_v32 = vmul.f32 %v2159_v7, %v2103_v12  ;;  %3085 = vmatprep.subr.bf16.mxu1 %v3465_v57 }
 0x66e   : > { %v3558_v9 = vpop.eup %3557 }
 0x66f   : > { %v2160_v33 = vadd.f32 1.0, %v3558_v9  ;;  %v2165_v24 = vmul.f32 %v2157_v14, %v2101_v20 }
 0x670   : > { %3086 = vmatpush3.bf16.msra.mxu1 %v3466_v42 }
 0x671   : > { %v3560_v15 = vpop.eup %3559  ;;  %v2168_v47 = vmul.f32 %v2160_v33, %v2104_v2  ;;  %3087 = vmatprep.subr.bf16.mxu1 %v3467_v28 }
 0x672   : > { %v2158_v50 = vadd.f32 1.0, %v3560_v15 }
 0x673   : > { %v2172_v19 = vpack.c.bf16 %v2168_v47, %v2167_v32 }
 0x674   : > { %v2166_v25 = vmul.f32 %v2158_v50, %v2102_v21  ;;  %3088 = vmatpush3.bf16.msra.mxu1 %v3468_v38 }
 0x675   : > { %3089 = vmatprep.subr.bf16.mxu1 %v3469_v11 }
 0x676   : > { %v2171_v37 = vpack.c.bf16 %v2166_v25, %v2165_v24 }
 0x678   : > { %v3562_v22 = vpop.eup %3561  ;;  %3338 = vmatprep.mubr.msk.bf16.mxu0 %vm785_vm1, %v2171_v37  ;;  %3090 = vmatpush3.bf16.msra.mxu1 %v3470_v18 }
 0x679   : > { %3339 = vmatmul.mubr.msk.bf16.gmra.mxu0 %vm785_vm1, %v2172_v19  ;;  %v1928_v6 = vadd.f32 1.0, %v3562_v22  ;;  %3091 = vmatprep.subr.bf16.mxu1 %v3471_v46 }
 0x67b   : > { %v1929_v43 = vmul.f32 %v1928_v6, %v1921_v34 }
 0x67c   : > { %3092 = vmatpush3.bf16.msra.mxu1 %v3472_v45 }
 0x67d   : > { %v1932_v35 = vmul.f32 %v2787_v13, %v1929_v43 }
 0x67f   : > { %v1933_v58 = vsel %vm508_vm2, %v1932_v35, 0.0 }
 0x680   : > { %1934 = vadd.xlane.f32.xlu1 %v1933_v58 }
 0x709   : > { %v1935_v1 = vpop.xlane.xlu1 %1934 }
 0x70a   : > { %v1938_v52 = vadd.f32 %v2788_v51, %v1935_v1 }
 0x70c   : > { %v1939_v53 = vmul.f32 0.5, %v1938_v52 }
 0x70e   : > { %3563 = vtanh.f32 %v1939_v53 }
 0x71b   : > { %v3564_v55 = vpop.eup %3563 }
 0x71c   : > { %v1941_v56 = vadd.f32 1.0, %v3564_v55 }
 0x71e   : > { %v1942_v31 = vmul.f32 0.5, %v1941_v56 }
 0x720   : > { %3346 = vpush %v1942_v31 }
 0x728   : > { %v3336_v61 = vpop.f32.mrf.mxu0 }
 0x729   : > { %v2269_v9 = vadd.f32 %v3336_v61, %v2824_v62 }
 0x72a   : > { %v2260_v63 = vpop.f32.mrf.mxu0 }
 0x72b   : > { %v2261_v3 = vadd.f32 %v2824_v62, %v2260_v63  ;;  %v2293_v2 = vmul.f32 0.5, %v2269_v9 }
 0x72c   : > { %v3337_v4 = vpop.f32.mrf.mxu0 }
 0x72d   : > { %v2291_v59 = vmul.f32 0.5, %v2261_v3  ;;  %v2272_v5 = vadd.f32 %v3337_v4, %v2824_v62 }
 0x72e   : > { %v2263_v29 = vpop.f32.mrf.mxu0 }
 0x72f   : > { %3565 = vtanh.f32 %v2291_v59  ;;  %v2264_v39 = vadd.f32 %v2824_v62, %v2263_v29  ;;  %v2294_v14 = vmul.f32 0.5, %v2272_v5 }
 0x731   : > { %v2292_v44 = vmul.f32 0.5, %v2264_v39 }
 0x733   : > { %3567 = vtanh.f32 %v2292_v44 }
 0x734   : > { %3569 = vtanh.f32 %v2294_v14 }
 0x735   : > { %3571 = vtanh.f32 %v2293_v2 }
 0x739   : > { %v3340_v33 = vpop.f32.mrf.mxu0 }
 0x73a   : > { %v2285_v13 = vadd.f32 %v3340_v33, %v2824_v62 }
 0x73b   : > { %v2276_v15 = vpop.f32.mrf.mxu0 }
 0x73c   : > { %v3566_v7 = vpop.eup %3565  ;;  %v2277_v12 = vadd.f32 %v2824_v62, %v2276_v15  ;;  %v2297_v58 = vmul.f32 0.5, %v2285_v13 }
 0x73d   : > { %v3341_v20 = vpop.f32.mrf.mxu0  ;;  %v2307_v50 = vadd.f32 1.0, %v3566_v7 }
 0x73e   : > { %v2295_v22 = vmul.f32 0.5, %v2277_v12  ;;  %v2288_v34 = vadd.f32 %v3341_v20, %v2824_v62 }
 0x73f   : > { %v2279_v21 = vpop.f32.mrf.mxu0  ;;  %v2315_v37 = vmul.f32 0.5, %v2307_v50 }
 0x740   : > { %v2280_v47 = vadd.f32 %v2824_v62, %v2279_v21  ;;  %v3568_v24 = vpop.eup %3567  ;;  %v2298_v43 = vmul.f32 0.5, %v2288_v34 }
 0x741   : > { %v2308_v25 = vadd.f32 1.0, %v3568_v24  ;;  %v3570_v35 = vpop.eup %3569 }
 0x742   : > { %v2296_v32 = vmul.f32 0.5, %v2280_v47  ;;  %v3572_v36 = vpop.eup %3571  ;;  %v2310_v0 = vadd.f32 1.0, %v3570_v35 }
 0x743   : > { %v2316_v19 = vmul.f32 0.5, %v2308_v25  ;;  %v2309_v23 = vadd.f32 1.0, %v3572_v36 }
 0x744   : > { %3573 = vtanh.f32 %v2296_v32  ;;  %v2318_v26 = vmul.f32 0.5, %v2310_v0 }
 0x745   : > { %v2327_v6 = vpack.c.bf16 %v2316_v19, %v2315_v37  ;;  %3575 = vtanh.f32 %v2295_v22  ;;  %v2317_v57 = vmul.f32 0.5, %v2309_v23 }
 0x746   : > { %3577 = vtanh.f32 %v2298_v43 }
 0x747   : > { %2500 = vmatprep.mubr.bf16.mxu1 %v2327_v6  ;;  %3579 = vtanh.f32 %v2297_v58  ;;  %v2328_v11 = vpack.c.bf16 %v2318_v26, %v2317_v57 }
 0x751   : > { %s3347_s30 = spop %3346  ;;  %v3574_v60 = vpop.eup %3573 }
 0x752   : > { %v1945_v30 = vstv %s3347_s30  ;;  %v3576_v42 = vpop.eup %3575  ;;  %v2312_v38 = vadd.f32 1.0, %v3574_v60  ;;  %s3581_s30 = scalar_lea.vmem %s2562_s22, 16 }
 0x753   : > { %v1947_v8 = vmul.f32 %v1945_v30, %v4383_v48  ;;  %v1948_v41 = vmul.f32 %v1945_v30, %v4385_v49  ;;  %v2311_v18 = vadd.f32 1.0, %v3576_v42  ;;  %v1949_v46 = vmul.f32 %v1945_v30, %v4389_v40  ;;  %v3578_v1 = vpop.eup %3577  ;;  %p3582_p11 = scmp.ne.s32.totalorder %s2562_s22, %s3581_s30  ;;  %p3589_p1 = scmp.lt.s32.totalorder %s3587_s21, %s3581_s30 }
 0x754   : > { %v1950_v45 = vmul.f32 %v1945_v30, %v4391_v17  ;;  %v2320_v51 = vmul.f32 0.5, %v2312_v38  ;;  %v3580_v53 = vpop.eup %3579  ;;  %v2314_v48 = vadd.f32 1.0, %v3578_v1  ;;  %v1951_v31 = vmul.f32 %v1945_v30, %v4398_v10 }
 0x755   : > { %v2323_v28 = vpack.c.bf16 %v1948_v41, %v1947_v8  ;;  %v2319_v52 = vmul.f32 0.5, %v2311_v18  ;;  %v2313_v49 = vadd.f32 1.0, %v3580_v53  ;;  %v1952_v61 = vmul.f32 %v1945_v30, %v4400_v54  ;;  %p3583_p12 = pnand %p3582_p11, %p3744_p5  ;;  %p3590_p2 = por %p3589_p1, %p3588_p0 }
 0x756   : > { %v2324_v55 = vpack.c.bf16 %v1950_v45, %v1949_v46  ;;  %v2322_v62 = vmul.f32 0.5, %v2314_v48  ;;  %v1953_v17 = vmul.f32 %v1945_v30, %v4406_v16  ;;  %v1954_v4 = vmul.f32 %v1945_v30, %v4410_v27  ;;  %v2866_v16 = vld [vmem:[%s4592_s10 + $0x2] ss:$0 sm:$0xff] }
 0x757   : > { %2501 = vmatmul.mubr.bf16.vlgmr.msra.gmra.mxu1 %v2323_v28  ;;  %v2329_v56 = vpack.c.bf16 %v2320_v51, %v2319_v52  ;;  %v2321_v63 = vmul.f32 0.5, %v2313_v49  ;;  %v2325_v3 = vpack.c.bf16 %v1952_v61, %v1951_v31  ;;  %p3584_p13 = pneg %p3583_p12 }
 0x758   : > { %2508 = vmatprep.mubr.bf16.mxu1 %v2328_v11  ;;  %v2326_v59 = vpack.c.bf16 %v1954_v4, %v1953_v17 }
 0x759   : > { %v2330_v40 = vpack.c.bf16 %v2322_v62, %v2321_v63  ;;  %p3591_p3 = pnand %p3590_p2, %p3584_p13 }
 0x75f   : > { %2509 = vmatmul.mubr.bf16.gmra.mxu1 %v2324_v55 }
 0x760   : > { %2516 = vmatprep.mubr.bf16.mxu1 %v2329_v56 }
 0x767   : > { %2517 = vmatmul.mubr.bf16.gmra.mxu1 %v2325_v3 }
 0x768   : > { %2524 = vmatprep.mubr.bf16.mxu1 %v2330_v40 }
 0x76f   : > { %2525 = vmatmul.mubr.bf16.gmra.mxu1 %v2326_v59 }
 0x817   : > { %v3093_v29 = vpop.f32.mrf.mxu1 }
 0x819   : > { %v3094_v39 = vpop.f32.mrf.mxu1 }
 0x81a   : > { %v3095_v2 = vadd.f32 %v3094_v39, %v3093_v29 }
 0x81b   : > { %v3096_v44 = vpop.f32.mrf.mxu1 }
 0x81c   : > { %v2503_v12 = vadd.f32 %v3095_v2, %v2866_v16 }
 0x81d   : > { %v3097_v5 = vpop.f32.mrf.mxu1 }
 0x81e   : > { %v3098_v14 = vadd.f32 %v3097_v5, %v3096_v44 }
 0x81f   : > { %v3099_v9 = vpop.f32.mrf.mxu1 }
 0x820   : > { %v2506_v27 = vadd.f32 %v3098_v14, %v2866_v16 }
 0x821   : > { %v3100_v10 = vpop.f32.mrf.mxu1 }
 0x822   : > { %v3101_v7 = vadd.f32 %v3100_v10, %v3099_v9  ;;  %v2533_v32 = vadd.f32 %v2506_v27, %v2503_v12 }
 0x823   : > { %v3102_v33 = vpop.f32.mrf.mxu1 }
 0x824   : > { %v2511_v47 = vadd.f32 %v3101_v7, %v2866_v16 }
 0x825   : > { %v3103_v54 = vpop.f32.mrf.mxu1 }
 0x826   : > { %v3104_v21 = vadd.f32 %v3103_v54, %v3102_v33  ;;  %v2534_v34 = vadd.f32 %v2533_v32, %v2511_v47 }
 0x827   : > { %v3105_v15 = vpop.f32.mrf.mxu1 }
 0x828   : > { %v2514_v37 = vadd.f32 %v3104_v21, %v2866_v16 }
 0x829   : > { %v3106_v20 = vpop.f32.mrf.mxu1 }
 0x82a   : > { %v3107_v24 = vadd.f32 %v3106_v20, %v3105_v15  ;;  %v2535_v43 = vadd.f32 %v2534_v34, %v2514_v37 }
 0x82b   : > { %v3108_v50 = vpop.f32.mrf.mxu1 }
 0x82c   : > { %v2519_v6 = vadd.f32 %v3107_v24, %v2866_v16 }
 0x82d   : > { %v3109_v25 = vpop.f32.mrf.mxu1 }
 0x82e   : > { %v3110_v19 = vadd.f32 %v3109_v25, %v3108_v50  ;;  %v2536_v0 = vadd.f32 %v2535_v43, %v2519_v6 }
 0x82f   : > { %v3111_v22 = vpop.f32.mrf.mxu1 }
 0x830   : > { %v2522_v35 = vadd.f32 %v3110_v19, %v2866_v16 }
 0x831   : > { %v3112_v13 = vpop.f32.mrf.mxu1 }
 0x832   : > { %v3113_v58 = vadd.f32 %v3112_v13, %v3111_v22  ;;  %v2537_v30 = vadd.f32 %v2536_v0, %v2522_v35 }
 0x833   : > { %v3114_v36 = vpop.f32.mrf.mxu1 }
 0x834   : > { %v2527_v23 = vadd.f32 %v3113_v58, %v2866_v16 }
 0x835   : > { %v3115_v26 = vpop.f32.mrf.mxu1 }
 0x836   : > { %v3116_v60 = vadd.f32 %v3115_v26, %v3114_v36  ;;  %v2538_v8 = vadd.f32 %v2537_v30, %v2527_v23 }
 0x838   : > { %v2530_v41 = vadd.f32 %v3116_v60, %v2866_v16 }
 0x83a   : > { %v2539_v57 = vadd.f32 %v2538_v8, %v2530_v41 }
 0x83c   : > { %v2540_v42 = vrot.slane %v2539_v57, 4 }
 0x83e   : > { %v2541_v28 = vadd.f32 %v2540_v42, %v2539_v57 }
 0x840   : > { %v2542_v38 = vrot.slane %v2541_v28, 2 }
 0x842   : > { %v2543_v11 = vadd.f32 %v2542_v38, %v2541_v28 }
 0x844   : > { %v2544_v18 = vrot.slane %v2543_v11, 1 }
 0x846   : > { %v2545_v46 = vadd.f32 %v2544_v18, %v2543_v11 }
 0x848   : > { %v2546_v45 = vmul.f32 0.015625, %v2545_v46 }
 0x84a   : > { %2547 = vst [vmem:[%s379_s15] sm:$0x1] %v2546_v45 }
 0x84b   : > { %3594 = shalt.err (!%p3591_p3)
}
 0x84c   : > { %s3595_s0 = scalar_lea.hbm %s2559_s24, 16  ;;  %s3599_s15 = scalar_lea.hbm %s4593_s11, 32 }
 0x84d   : > { %p3596_p4 = scmp.ne.s32.totalorder %s2559_s24, %s3595_s0  ;;  %p3600_p9 = scmp.lt.s32.totalorder %s2559_s24, %s4593_s11 }
 0x84e   : > { %p3601_p10 = scmp.lt.s32.totalorder %s3599_s15, %s3595_s0 }
 0x84f   : > { %p3597_p7 = pnand %p3596_p4, %p3744_p5 }
 0x850   : > { %p3602_p11 = por %p3601_p10, %p3600_p9 }
 0x851   : > { %p3598_p8 = pneg %p3597_p7 }
 0x853   : > { %p3603_p12 = pnand %p3602_p11, %p3598_p8 }
 0x855   : > { %3606 = shalt.err (!%p3603_p12)
}
 0x856   : > { %3348 = dma.vmem_to_hbm [thread:$0]  (%p3744_p5), %s2562_s22, 16, %s2559_s24, %s2549_s29  }
 0x857 PF: > { %p3354_p13 = scmp.ge.s32.totalorder %s3641_s20, 2  ;;  %s2573_s30 = sand.u32 1, %s3629_s17  }
 0x858   : > { %s2574_s12 = scalar_lea.sflag [#allocation3], %s2573_s30 }
 0x859   : > { %p3351_p0 = pnand %p3354_p13, %p3748_p6 }
 0x85b   : > { %p3352_p1 = pneg %p3351_p0 }
 0x85d   : > { %3624 = dma.done.wait (%p3352_p1), %s2574_s12, 16  }
 0x85e   : > { %3626 = vsyncadd (%p3352_p1), %s2574_s12, 4294967280  ;;  %s4599_s0 = sld [smem:[#allocation5_spill]]  ;;  %p21_p2 = scmp.ge.s32.totalorder %s3731_s23, 4  }
 0x85f   : > { %s4600_s17 = smov %s3633_s18  ;;  %s4601_s18 = smov %s3637_s19 }
 0x860   : > { %s4603_s20 = smov %s3731_s23  ;;  %23 = sbr.rel (!%p21_p2) target bundleno = 5 (0x5), region = 119 }
 0x864   : > { %s4602_s19 = smov %s4599_s0 }
 0x865   :  { %2578 = vsyncpa [#allocation3], 1 }
 0x866   :  { %2580 = vsyncpa [#allocation3 + $0x1], 1 }

</bundles_post_ra>
